<compile_context>
chip_gen: v5e
topology: v5e:2x2
jax: 0.10.0
libtpu: 0.0.40
codegen_flags: <defaults>
</compile_context>

<pallas_src>
import numpy as np
import jax
import jax.numpy as jnp
from jax.experimental import pallas as pl
from jax.experimental.pallas import tpu as pltpu

_MIN_PALLAS_ELEMS = 64 * 1024          # below this, fused XLA elementwise wins
_TARGET_BLOCK_ELEMS = 2 * 1024 * 1024  # ~10 MiB (1B in + 4B out) per grid step
_MAX_BLOCK_ELEMS = 4 * 1024 * 1024     # ~40 MiB double-buffered hard cap
_H_ALIGN = 32                          # uint8 sublane packing: (32, 128) tiles
_LANE = 128


def _round_up(v: int, m: int) -> int:
    return ((v + m - 1) // m) * m


def _padded_elems(b: int, h: int, w: int) -> int:
    # Conservative tile-padded element count of a (b, h, w) block in VMEM.
    return b * _round_up(h, _H_ALIGN) * _round_up(w, _LANE)


def _to_tensor_kernel(x_ref, o_ref):
    # Exact PyTorch semantics: x.float().div(255)  (true f32 divide).
    o_ref[...] = x_ref[...].astype(jnp.float32) / jnp.float32(255.0)


def _plan(B: int, H: int, W: int):
    """Pick (block_shape, grid, index_map, dimension_semantics) for (B, H, W)."""
    per_image = H * W
    if B >= 2 and _padded_elems(1, H, W) <= _MAX_BLOCK_ELEMS:
        # Tile only the collapsed leading (batch*channel) axis; blocks keep the
        # full (H, W) extents -> always layout-legal, lane-dense if W % 128 == 0.
        target_b = max(1, _TARGET_BLOCK_ELEMS // per_image)
        # Near-even split, >= 2 steps so v7x can shard across both TCs.
        n_steps = min(B, max(2, pl.cdiv(B, target_b)))
        b_block = pl.cdiv(B, n_steps)
        block = (b_block, H, W)
        grid = (pl.cdiv(B, b_block),)
        index_map = lambda i: (i, 0, 0)
        semantics = ("parallel",)
    else:
        # Single image (B == 1) or very large per-image size: tile H instead.
        # h_block is a multiple of 32 (uint8 packing) or the full H extent;
        # the last block dim is always the full W extent.
        target_h = max(_H_ALIGN,
                       (_TARGET_BLOCK_ELEMS // max(W, 1)) // _H_ALIGN * _H_ALIGN)
        if H <= target_h:
            h_block = H
            if B == 1 and H >= 2 * _H_ALIGN:
                # Split in two so the grid has >= 2 steps (v7x dual-TC).
                cand = _round_up(pl.cdiv(H, 2), _H_ALIGN)
                if cand < H:
                    h_block = cand
        else:
            n_steps = pl.cdiv(H, target_h)
            h_block = min(_round_up(pl.cdiv(H, n_steps), _H_ALIGN), H)
        block = (1, h_block, W)
        grid = (B, pl.cdiv(H, h_block))
        index_map = lambda b, i: (b, i, 0)
        semantics = ("parallel", "parallel")
    return block, grid, index_map, semantics


def image_array_to_tensor(x: jax.Array) -> jax.Array:
    """Pallas equivalent of ImageArrayToTensor.forward (uint8 -> f32 in [0,1])."""
    orig_shape = x.shape
    total = int(np.prod(orig_shape)) if x.ndim else 1

    # Tiny or rank-deficient inputs: plain XLA elementwise (no launch overhead).
    if x.ndim < 2 or total < _MIN_PALLAS_ELEMS:
        return x.astype(jnp.float32) / jnp.float32(255.0)

    H, W = orig_shape[-2], orig_shape[-1]
    B = total // (H * W)

    block, grid, index_map, semantics = _plan(B, H, W)

    blk_pad = _padded_elems(*block)
    if blk_pad > _MAX_BLOCK_ELEMS:
        # Degenerate shapes where even a minimal block blows the VMEM budget.
        return x.astype(jnp.float32) / jnp.float32(255.0)

    # 1 B uint8 in + 4 B f32 out, double-buffered, on tile-padded extents,
    # plus headroom.  Needed on v5e (16 MiB scoped default) for large blocks.
    vmem_limit = int(2 * blk_pad * 5 + (4 << 20))

    # Collapsing only the leading dims is a pure layout bitcast (no HBM copy),
    # unlike a flatten-to-(rows, 128) reshape.
    x3 = jnp.reshape(x, (B, H, W))

    out3 = pl.pallas_call(
        _to_tensor_kernel,
        out_shape=jax.ShapeDtypeStruct((B, H, W), jnp.float32),
        grid_spec=pltpu.PrefetchScalarGridSpec(
            num_scalar_prefetch=0,
            grid=grid,
            in_specs=[pl.BlockSpec(block, index_map)],
            out_specs=pl.BlockSpec(block, index_map),
        ),
        compiler_params=pltpu.CompilerParams(
            dimension_semantics=semantics,
            vmem_limit_bytes=vmem_limit),
        cost_estimate=pl.CostEstimate(
            flops=total, transcendentals=0, bytes_accessed=5 * total),
    )(x3)

    return jnp.reshape(out3, orig_shape)  # expand leading dims: bitcast, no copy


if __name__ == "__main__":
    key = jax.random.PRNGKey(0)
    k1, k2, k3, k4, k5 = jax.random.split(key, 5)

    def ref(x):
        return x.astype(jnp.float32) / jnp.float32(255.0)

    def check(x):
        y = jax.block_until_ready(image_array_to_tensor(x))
        assert y.shape == x.shape and y.dtype == jnp.float32
        np.testing.assert_allclose(np.asarray(y), np.asarray(ref(x)),
                                   rtol=0, atol=0)

    def rand_u8(k, shape):
        return jax.random.randint(k, shape, 0, 256, dtype=jnp.int32).astype(jnp.uint8)

    # Small (N, C, H, W) uint8 image batch -> XLA fallback path (+ 3D / 2D views).
    x_small = rand_u8(k1, (2, 4, 16, 16))
    check(x_small)
    check(x_small[0])        # (C, H, W)
    check(x_small[0, 0])     # (H, W)

    # W not a multiple of 128 (224-class images) -> Pallas batch-tiling path,
    # full (H, W) blocks, no relayout copies, masked lane stores.
    check(rand_u8(k2, (4, 3, 224, 224)))

    # W a multiple of 128 -> fully lane-dense stores, batch-tiling path.
    check(rand_u8(k3, (16, 4, 128, 128)))

    # Odd H/W (neither multiple of 32/128), 3D (N, H, W) input.
    check(rand_u8(k4, (8, 300, 200)))

    # Single 2D image -> H-tiling path (grid split over H for dual-TC).
    check(rand_u8(k5, (512, 640)))

    print("KERNEL_OK")
</pallas_src>

<mosaic_0001>
module attributes {stable_mosaic.version = 11 : i64} {
  func.func @_to_tensor_kernel(%arg0: i32, %arg1: memref<6x224x224xi8, #tpu.memory_space<vmem>>, %arg2: memref<6x224x224xf32, #tpu.memory_space<vmem>>) attributes {dimension_semantics = [#tpu.dimension_semantics<parallel>], iteration_bounds = array<i64: 2>, scalar_prefetch = 0 : i64, scratch_operands = 0 : i64, tpu.core_type = #tpu.core_type<tc>, window_params = [{transform_indices = @transform_0, window_bounds = array<i64: 6, 224, 224>}, {transform_indices = @transform_1, window_bounds = array<i64: 6, 224, 224>}]} {
    %c0 = arith.constant 0 : index
    %c0_0 = arith.constant 0 : index
    %c0_1 = arith.constant 0 : index
    %0 = vector.load %arg1[%c0, %c0_0, %c0_1] : memref<6x224x224xi8, #tpu.memory_space<vmem>>, vector<6x224x224xi8>
    %1 = arith.uitofp %0 : vector<6x224x224xi8> to vector<6x224x224xf32>
    %cst = arith.constant 2.550000e+02 : f32
    %2 = vector.broadcast %cst : f32 to vector<6x224x224xf32>
    %3 = arith.divf %1, %2 : vector<6x224x224xf32>
    %c0_2 = arith.constant 0 : index
    %c0_3 = arith.constant 0 : index
    %c0_4 = arith.constant 0 : index
    %4 = vector.load %arg2[%c0_2, %c0_3, %c0_4] : memref<6x224x224xf32, #tpu.memory_space<vmem>>, vector<6x224x224xf32>
    tpu.vector_store %arg2[%c0_2, %c0_3, %c0_4], %3 {strides = array<i32>} : memref<6x224x224xf32, #tpu.memory_space<vmem>>, vector<6x224x224xf32>,
    return
  }
  func.func @transform_0(%arg0: i32) -> (i32, i32, i32) {
    %c0_i32 = arith.constant 0 : i32
    %c0_i32_0 = arith.constant 0 : i32
    %c0_i32_1 = arith.constant 0 : i32
    return %arg0, %c0_i32, %c0_i32_0 : i32, i32, i32
  }
  func.func @transform_1(%arg0: i32) -> (i32, i32, i32) {
    %c0_i32 = arith.constant 0 : i32
    %c0_i32_0 = arith.constant 0 : i32
    %c0_i32_1 = arith.constant 0 : i32
    return %arg0, %c0_i32, %c0_i32_0 : i32, i32, i32
  }
}

</mosaic_0001>

<bundles_post_ra>
// kernel: tpu_custom_call.1
= control target key start
LH: loop header
LB: loop body
LE: loop exit
PB: predicated region body
PF: predicated region fallthrough
CT: control target
= control target key end

     0   :  { %6 = vsyncpa [#allocation3], 0  ;;  %s3234_s0 = inlined_call_operand.hbm [shape: u8[12,224,224], index: 0, kind: input, shape index: {}]   ;;  %s3235_s1 = inlined_call_operand.hbm [shape: f32[12,224,224], index: 1, kind: output, shape index: {}]  }
   0x1   :  { %8 = vsyncpa [#allocation3 + $0x1], 0 }
   0x2   :  { %9 = vsyncpa [#allocation4], 0 }
   0x3   :  { %11 = vsyncpa [#allocation4 + $0x1], 0  ;;  %s2183_s6 = smov 0   ;;  %s2185_s7 = smov 0  }
   0x4   :  { %s2187_s8 = smov 0   ;;  %s2189_s9 = smov 0  }
   0x5 LB: > { %s2204_s10 = sadd.s32 4294967295, %s2166_s9   ;;  %s2002_s11 = sadd.s32 4294967294, %s2166_s9   ;;  %s2166_s9 = sphi %s2189_s9, %s3243_s9   ;;  %s2162_s8 = sphi %s2187_s8, %s3242_s8   ;;  %s2158_s7 = sphi %s2185_s7, %s3241_s7   ;;  %s2154_s6 = sphi %s2183_s6, %s3240_s6  }
   0x6   : > { %s2208_s12 = sadd.s32 1, %s2166_s9   ;;  %s24_s13 = sadd.s32 1, %s2162_s8 }
   0x7   : > { %s21_s14 = ssub.s32 %s2166_s9, %s2208_s12  ;;  %p31_p0 = scmp.ne.s32.totalorder %s2162_s8, %s2158_s7 }
   0x8   : > { %p22_p1 = scmp.eq.s32.totalorder %s21_s14, 0  ;;  %p32_p2 = scmp.eq.s32.totalorder %s2166_s9, 0 }
   0x9   : > { %p37_p3 = scmp.ne.s32.totalorder %s2158_s7, %s2154_s6  ;;  %p38_p4 = scmp.eq.s32.totalorder %s2204_s10, 0 }
   0xa   : > { %s2220_s15 = scalar_select %p22_p1, %s2162_s8, %s24_s13  }
   0xb   : > { %p33_p5 = por %p32_p2, %p31_p0  ;;  %p2222_p6 = por %p38_p4, %p37_p3 }
   0xc   : > { %p61_p7 = scmp.eq.s32.totalorder %s2204_s10, 1  ;;  %p67_p8 = scmp.eq.s32.totalorder %s2002_s11, 1 }
   0xd   : > { %p2004_p9 = scmp.ge.s32.totalorder %s2166_s9, 2  ;;  %p2027_p10 = scmp.lt.s32.totalorder %s2166_s9, 2 }
   0xe   : > { %p2229_p11 = por %p61_p7, %p31_p0  ;;  %p2233_p12 = por %p67_p8, %p37_p3 }
   0xf   : > { %s87_s19 = sand.u32 1, %s2162_s8   ;;  %s2028_s21 = smul.u32 672, %s2166_s9 }
  0x10   : > { %s2010_s20 = smul.u32 672, %s87_s19  ;;  %p2239_p13 = pnand %p2027_p10, %p33_p5 }
  0x11   : > { %s97_s25 = scalar_lea.hbm %s3234_s0, %s2028_s21  ;;  %p2006_p0 = scmp.ge.s32.totalorder %s2166_s9, 1 }
  0x12   : > { %s91_s26 = scalar_lea.vmem [#allocation2], %s2010_s20  ;;  %s98_s28 = sshll.u32 %s97_s25, 4  ;;  %s99_s28 = int_to_ptr.hbm [resolvable:$true] %s98_s28 }
  0x13   : > { %s100_s27 = sshll.u32 %s91_s26, 4  ;;  %s88_s29 = scalar_lea.sflag [#allocation3], %s87_s19  ;;  %s101_s27 = int_to_ptr.vmem [resolvable:$true] %s100_s27 }
  0x14   : > { %s2070_s30 = sshra.s32 %s99_s28, 4  ;;  %p2074_p2 = pneg %p2239_p13  ;;  %s2071_s30 = int_to_ptr.hbm [resolvable:$true] %s2070_s30 }
  0x15   : > { %s2072_s2 = scalar_lea.hbm %s2071_s30, 672  ;;  %s2077_s5 = scalar_lea.hbm %s3234_s0, 1344 }
  0x16   : > { %p2073_p1 = scmp.ne.s32.totalorder %s2071_s30, %s2072_s2  ;;  %p2078_p5 = scmp.lt.s32.totalorder %s2071_s30, %s3234_s0 }
  0x17   : > { %p2079_p7 = scmp.lt.s32.totalorder %s2077_s5, %s2072_s2 }
  0x18   : > { %p2075_p3 = pnand %p2074_p2, %p2073_p1 }
  0x19   : > { %p2080_p8 = por %p2079_p7, %p2078_p5 }
  0x1a   : > { %p2076_p4 = pneg %p2075_p3 }
  0x1c   : > { %p2081_p10 = pnand %p2080_p8, %p2076_p4 }
  0x1e   : > { %2084 = shalt.err (!%p2081_p10)
}
  0x1f   : > { %s2168_s14 = smov 256   ;;  %s2169_s19 = smov 16  }
  0x20   : > { %2022 = dma.hbm_to_vmem [thread:$0]  (!%p2239_p13), %s99_s28, 10752, %s101_s27, %s88_s29, %s2168_s14, %s2168_s14, %s2169_s19  }
  0x21   : > { %p108_p1 = scmp.lt.s32.totalorder %s2166_s9, 3 }
  0x23   : > { %p109_p2 = pnand %p2006_p0, %p108_p1 }
  0x24   : > { %s2261_s20 = sand.u32 (!%p109_p2), 1, %s2158_s7  }
  0x25   : > { %112 = sbr.rel (%p109_p2) target bundleno = 401 (0x191), region = 24  ;;  %s115_s23 = scalar_lea.sflag (!%p109_p2), [#allocation3], %s2261_s20 }
  0x26   : > { %s2012_s21 = smul.u32 (!%p109_p2), 672, %s2261_s20 }
  0x28   : > { %s2265_s24 = scalar_lea.vmem (!%p109_p2), [#allocation2], %s2012_s21 }
  0x2a   : > { %2145 = dma.done.wait (%p2222_p6), %s115_s23, 10752  }
  0x2b   : > { %2147 = vsyncadd (%p2222_p6), %s115_s23, 4294956544  ;;  %v2170_v0 = vmov 255.0   ;;  %v140_v2 = vld [vmem:[%s2265_s24] sm:$0xff]  ;;  %v141_v3 = vld [vmem:[%s2265_s24 + $0x8] sm:$0xff]  ;;  %vm1576_vm0 = vcmask 785408   ;;  %s2013_s16 = smul.u32 2688, %s2261_s20 }
  0x2c   : > { %2068 = vrcp.f32 %v2170_v0  ;;  %v224_v4 = vunpack.c.0.s8 %v140_v2  ;;  %v225_v6 = vunpack.c.0.s8 %v141_v3  ;;  %v226_v7 = vunpack.c.1.s8 %v140_v2  ;;  %v142_v19 = vld [vmem:[%s2265_s24 + $0x10] sm:$0xff]  ;;  %v143_v23 = vld [vmem:[%s2265_s24 + $0x18] sm:$0xff]  ;;  %v144_v55 = vld [vmem:[%s2265_s24 + $0x20] sm:$0xff]  ;;  %s2029_s25 = smul.u32 2688, %s2204_s10  ;;  %s1913_s30 = scalar_lea.sflag [#allocation4], %s2261_s20 }
  0x2d   : > { %v227_v8 = vunpack.c.1.s8 %v141_v3  ;;  %v228_v9 = vunpack.c.2.s8 %v140_v2  ;;  %v229_v10 = vunpack.c.2.s8 %v141_v3  ;;  %v230_v14 = vunpack.c.3.s8 %v140_v2  ;;  %s2283_s22 = scalar_lea.vmem [#allocation5], %s2013_s16  ;;  %v145_v0 = vld [vmem:[%s2265_s24 + $0x28] sm:$0xff]  ;;  %s2120_s11 = scalar_lea.hbm %s3235_s1, 5376 }
  0x2e   : > { %v560_v11 = vand.u32 255, %v224_v4  ;;  %v561_v13 = vand.u32 255, %v225_v6  ;;  %v562_v15 = vand.u32 255, %v226_v7  ;;  %v231_v30 = vunpack.c.3.s8 %v141_v3  ;;  %s1925_s27 = scalar_lea.hbm %s3235_s1, %s2029_s25  ;;  %s1926_s28 = sshll.u32 %s2283_s22, 4  ;;  %s1927_s28 = int_to_ptr.vmem [resolvable:$true] %s1926_s28 }
  0x2f   : > { %v563_v16 = vand.u32 255, %v227_v8  ;;  %v564_v17 = vand.u32 255, %v228_v9  ;;  %v565_v18 = vand.u32 255, %v229_v10  ;;  %v566_v27 = vand.u32 255, %v230_v14  ;;  %s1928_s29 = sshll.u32 %s1925_s27, 4  ;;  %s1929_s29 = int_to_ptr.hbm [resolvable:$true] %s1928_s29 }
  0x30   : > { %v896_v20 = vcvt.s32.f32 %v560_v11  ;;  %v897_v22 = vcvt.s32.f32 %v561_v13  ;;  %v898_v24 = vcvt.s32.f32 %v562_v15  ;;  %v232_v31 = vunpack.c.0.s8 %v142_v19  ;;  %s2114_s2 = sshra.s32 %s1929_s29, 4  ;;  %s2115_s2 = int_to_ptr.hbm [resolvable:$true] %s2114_s2 }
  0x31   : > { %v899_v25 = vcvt.s32.f32 %v563_v16  ;;  %v900_v26 = vcvt.s32.f32 %v564_v17  ;;  %v901_v29 = vcvt.s32.f32 %v565_v18  ;;  %v233_v32 = vunpack.c.0.s8 %v143_v23  ;;  %s2116_s3 = scalar_lea.hbm %s2115_s2, 2688  ;;  %p2121_p3 = scmp.lt.s32.totalorder %s2115_s2, %s3235_s1 }
  0x32   : > { %v2069_v1 = vpop.eup %2068  ;;  %v234_v33 = vunpack.c.1.s8 %v142_v19  ;;  %v235_v34 = vunpack.c.1.s8 %v143_v23  ;;  %v236_v35 = vunpack.c.2.s8 %v142_v19  ;;  %v567_v37 = vand.u32 255, %v231_v30  ;;  %p2117_p6 = scmp.ne.s32.totalorder %s2115_s2, %s2116_s3  ;;  %p2122_p4 = scmp.lt.s32.totalorder %s2120_s11, %s2116_s3 }
  0x33   : > { %v1233_v5 = vmul.f32 255.0, %v2069_v1  ;;  %vm1237_vm1 = vweird.f32 %v2069_v1  ;;  %v568_v38 = vand.u32 255, %v232_v31  ;;  %v237_v39 = vunpack.c.2.s8 %v143_v23 }
  0x34   : > { %v902_v43 = vcvt.s32.f32 %v566_v27  ;;  %v903_v46 = vcvt.s32.f32 %v567_v37  ;;  %v569_v48 = vand.u32 255, %v233_v32  ;;  %v570_v49 = vand.u32 255, %v234_v33  ;;  %p2118_p13 = pnand %p2117_p6, %p2229_p11  ;;  %p2123_p5 = por %p2122_p4, %p2121_p3 }
  0x35   : > { %v1234_v12 = vsub.f32 1.0, %v1233_v5  ;;  %v904_v47 = vcvt.s32.f32 %v568_v38  ;;  %v571_v50 = vand.u32 255, %v235_v34  ;;  %v572_v52 = vand.u32 255, %v236_v35  ;;  %v147_v34 = vld [vmem:[%s2265_s24 + $0x38] sm:$0xff] }
  0x36   : > { %v573_v53 = vand.u32 255, %v237_v39  ;;  %v238_v54 = vunpack.c.3.s8 %v142_v19  ;;  %v905_v57 = vcvt.s32.f32 %v569_v48  ;;  %v906_v58 = vcvt.s32.f32 %v570_v49  ;;  %p2119_p0 = pneg %p2118_p13 }
  0x37   : > { %v1235_v21 = vmul.f32 %v2069_v1, %v1234_v12  ;;  %v907_v59 = vcvt.s32.f32 %v571_v50  ;;  %v908_v61 = vcvt.s32.f32 %v572_v52  ;;  %v239_v63 = vunpack.c.3.s8 %v143_v23 }
  0x38   : > { %v574_v62 = vand.u32 255, %v238_v54  ;;  %v909_v3 = vcvt.s32.f32 %v573_v53  ;;  %v240_v4 = vunpack.c.0.s8 %v144_v55  ;;  %v241_v10 = vunpack.c.0.s8 %v145_v0  ;;  %p2124_p7 = pnand %p2123_p5, %p2119_p0 }
  0x39   : > { %v1236_v28 = vadd.f32 %v2069_v1, %v1235_v21  ;;  %v575_v8 = vand.u32 255, %v239_v63  ;;  %v242_v11 = vunpack.c.1.s8 %v144_v55  ;;  %v243_v12 = vunpack.c.1.s8 %v145_v0 }
  0x3a   : > { %v910_v7 = vcvt.s32.f32 %v574_v62  ;;  %v576_v9 = vand.u32 255, %v240_v4  ;;  %v244_v15 = vunpack.c.2.s8 %v144_v55  ;;  %v245_v16 = vunpack.c.2.s8 %v145_v0 }
  0x3b   : > { %v2276_v36 = vsel %vm1237_vm1, %v2069_v1, %v1236_v28  ;;  %v911_v14 = vcvt.s32.f32 %v575_v8  ;;  %v577_v18 = vand.u32 255, %v241_v10  ;;  %v578_v19 = vand.u32 255, %v242_v11 }
  0x3c   : > { %v1239_v40 = vmul.f32 %v2276_v36, %v896_v20  ;;  %v1240_v41 = vmul.f32 %v2276_v36, %v897_v22  ;;  %v1241_v42 = vmul.f32 %v2276_v36, %v898_v24  ;;  %v1242_v44 = vmul.f32 %v2276_v36, %v899_v25  ;;  %v146_v25 = vld [vmem:[%s2265_s24 + $0x30] sm:$0xff] }
  0x3d   : > { %v1243_v45 = vmul.f32 %v2276_v36, %v900_v26  ;;  %v1244_v51 = vmul.f32 %v2276_v36, %v901_v29  ;;  %v1245_v56 = vmul.f32 %v2276_v36, %v902_v43  ;;  %v1246_v60 = vmul.f32 %v2276_v36, %v903_v46 }
  0x3e   : > { %1575 = vst [vmem:[%s2283_s22] sm:$0xff] %v1239_v40  ;;  %v1247_v1 = vmul.f32 %v2276_v36, %v904_v47  ;;  %v1248_v2 = vmul.f32 %v2276_v36, %v905_v57  ;;  %v1249_v5 = vmul.f32 %v2276_v36, %v906_v58  ;;  %v1250_v6 = vmul.f32 %v2276_v36, %v907_v59 }
  0x3f   : > { %1577 = vst.msk [vmem:[%s2283_s22 + $0x8] sm:$0xff] %vm1576_vm0, %v1240_v41  ;;  %v1251_v13 = vmul.f32 %v2276_v36, %v908_v61  ;;  %v912_v17 = vcvt.s32.f32 %v576_v9  ;;  %v579_v20 = vand.u32 255, %v243_v12  ;;  %v1252_v21 = vmul.f32 %v2276_v36, %v909_v3 }
  0x40   : > { %1578 = vst [vmem:[%s2283_s22 + $0x10] sm:$0xff] %v1241_v42  ;;  %v580_v22 = vand.u32 255, %v244_v15  ;;  %v581_v23 = vand.u32 255, %v245_v16  ;;  %v246_v24 = vunpack.c.3.s8 %v144_v55  ;;  %v1253_v26 = vmul.f32 %v2276_v36, %v910_v7 }
  0x41   : > { %1579 = vst.msk [vmem:[%s2283_s22 + $0x18] sm:$0xff] %vm1576_vm0, %v1242_v44  ;;  %v913_v27 = vcvt.s32.f32 %v577_v18  ;;  %v914_v28 = vcvt.s32.f32 %v578_v19  ;;  %v915_v29 = vcvt.s32.f32 %v579_v20  ;;  %v1254_v30 = vmul.f32 %v2276_v36, %v911_v14 }
  0x42   : > { %1580 = vst [vmem:[%s2283_s22 + $0x20] sm:$0xff] %v1243_v45  ;;  %v916_v31 = vcvt.s32.f32 %v580_v22  ;;  %v582_v32 = vand.u32 255, %v246_v24  ;;  %v247_v33 = vunpack.c.3.s8 %v145_v0  ;;  %v1255_v35 = vmul.f32 %v2276_v36, %v912_v17 }
  0x43   : > { %1581 = vst.msk [vmem:[%s2283_s22 + $0x28] sm:$0xff] %vm1576_vm0, %v1244_v51  ;;  %v1256_v37 = vmul.f32 %v2276_v36, %v913_v27  ;;  %v917_v38 = vcvt.s32.f32 %v581_v23  ;;  %v248_v39 = vunpack.c.0.s8 %v146_v25  ;;  %v1257_v40 = vmul.f32 %v2276_v36, %v914_v28 }
  0x44   : > { %1582 = vst [vmem:[%s2283_s22 + $0x30] sm:$0xff] %v1245_v56  ;;  %v1258_v41 = vmul.f32 %v2276_v36, %v915_v29  ;;  %v918_v42 = vcvt.s32.f32 %v582_v32  ;;  %v583_v43 = vand.u32 255, %v247_v33  ;;  %v249_v45 = vunpack.c.0.s8 %v147_v34 }
  0x45   : > { %1583 = vst.msk [vmem:[%s2283_s22 + $0x38] sm:$0xff] %vm1576_vm0, %v1246_v60  ;;  %v584_v44 = vand.u32 255, %v248_v39  ;;  %v250_v46 = vunpack.c.1.s8 %v146_v25  ;;  %v251_v47 = vunpack.c.1.s8 %v147_v34  ;;  %v1259_v48 = vmul.f32 %v2276_v36, %v916_v31  ;;  %v148_v60 = vld [vmem:[%s2265_s24 + $0x40] sm:$0xff] }
  0x46   : > { %1584 = vst [vmem:[%s2283_s22 + $0x40] sm:$0xff] %v1247_v1  ;;  %v919_v49 = vcvt.s32.f32 %v583_v43  ;;  %v252_v50 = vunpack.c.2.s8 %v146_v25  ;;  %v253_v51 = vunpack.c.2.s8 %v147_v34  ;;  %v585_v53 = vand.u32 255, %v249_v45 }
  0x47   : > { %1585 = vst.msk [vmem:[%s2283_s22 + $0x48] sm:$0xff] %vm1576_vm0, %v1248_v2  ;;  %v920_v52 = vcvt.s32.f32 %v584_v44  ;;  %v586_v54 = vand.u32 255, %v250_v46  ;;  %v587_v55 = vand.u32 255, %v251_v47  ;;  %v1260_v56 = vmul.f32 %v2276_v36, %v917_v38 }
  0x48   : > { %1586 = vst [vmem:[%s2283_s22 + $0x50] sm:$0xff] %v1249_v5  ;;  %v588_v57 = vand.u32 255, %v252_v50  ;;  %v589_v58 = vand.u32 255, %v253_v51  ;;  %v254_v59 = vunpack.c.3.s8 %v146_v25  ;;  %v1261_v61 = vmul.f32 %v2276_v36, %v918_v42  ;;  %v149_v5 = vld [vmem:[%s2265_s24 + $0x48] sm:$0xff] }
  0x49   : > { %1587 = vst.msk [vmem:[%s2283_s22 + $0x58] sm:$0xff] %vm1576_vm0, %v1250_v6  ;;  %v921_v62 = vcvt.s32.f32 %v585_v53  ;;  %v922_v63 = vcvt.s32.f32 %v586_v54  ;;  %v923_v0 = vcvt.s32.f32 %v587_v55  ;;  %v1262_v1 = vmul.f32 %v2276_v36, %v919_v49 }
  0x4a   : > { %1588 = vst [vmem:[%s2283_s22 + $0x60] sm:$0xff] %v1251_v13  ;;  %v924_v2 = vcvt.s32.f32 %v588_v57  ;;  %v590_v3 = vand.u32 255, %v254_v59  ;;  %v255_v4 = vunpack.c.3.s8 %v147_v34  ;;  %v1263_v6 = vmul.f32 %v2276_v36, %v920_v52 }
  0x4b   : > { %1589 = vst.msk [vmem:[%s2283_s22 + $0x68] sm:$0xff] %vm1576_vm0, %v1252_v21  ;;  %v1264_v7 = vmul.f32 %v2276_v36, %v921_v62  ;;  %v925_v8 = vcvt.s32.f32 %v589_v58  ;;  %v256_v9 = vunpack.c.0.s8 %v148_v60  ;;  %v1265_v10 = vmul.f32 %v2276_v36, %v922_v63 }
  0x4c   : > { %1590 = vst [vmem:[%s2283_s22 + $0x70] sm:$0xff] %v1253_v26  ;;  %v1266_v11 = vmul.f32 %v2276_v36, %v923_v0  ;;  %v926_v12 = vcvt.s32.f32 %v590_v3  ;;  %v591_v13 = vand.u32 255, %v255_v4  ;;  %v257_v15 = vunpack.c.0.s8 %v149_v5 }
  0x4d   : > { %1591 = vst.msk [vmem:[%s2283_s22 + $0x78] sm:$0xff] %vm1576_vm0, %v1254_v30  ;;  %v592_v14 = vand.u32 255, %v256_v9  ;;  %v258_v16 = vunpack.c.1.s8 %v148_v60  ;;  %v259_v17 = vunpack.c.1.s8 %v149_v5  ;;  %v1267_v18 = vmul.f32 %v2276_v36, %v924_v2  ;;  %v150_v30 = vld [vmem:[%s2265_s24 + $0x50] sm:$0xff] }
  0x4e   : > { %1592 = vst [vmem:[%s2283_s22 + $0x80] sm:$0xff] %v1255_v35  ;;  %v927_v19 = vcvt.s32.f32 %v591_v13  ;;  %v260_v20 = vunpack.c.2.s8 %v148_v60  ;;  %v261_v21 = vunpack.c.2.s8 %v149_v5  ;;  %v593_v23 = vand.u32 255, %v257_v15 }
  0x4f   : > { %1593 = vst.msk [vmem:[%s2283_s22 + $0x88] sm:$0xff] %vm1576_vm0, %v1256_v37  ;;  %v928_v22 = vcvt.s32.f32 %v592_v14  ;;  %v594_v24 = vand.u32 255, %v258_v16  ;;  %v595_v25 = vand.u32 255, %v259_v17  ;;  %v1268_v26 = vmul.f32 %v2276_v36, %v925_v8 }
  0x50   : > { %1594 = vst [vmem:[%s2283_s22 + $0x90] sm:$0xff] %v1257_v40  ;;  %v596_v27 = vand.u32 255, %v260_v20  ;;  %v597_v28 = vand.u32 255, %v261_v21  ;;  %v262_v29 = vunpack.c.3.s8 %v148_v60  ;;  %v1269_v31 = vmul.f32 %v2276_v36, %v926_v12  ;;  %v151_v40 = vld [vmem:[%s2265_s24 + $0x58] sm:$0xff] }
  0x51   : > { %1595 = vst.msk [vmem:[%s2283_s22 + $0x98] sm:$0xff] %vm1576_vm0, %v1258_v41  ;;  %v929_v32 = vcvt.s32.f32 %v593_v23  ;;  %v930_v33 = vcvt.s32.f32 %v594_v24  ;;  %v931_v34 = vcvt.s32.f32 %v595_v25  ;;  %v1270_v35 = vmul.f32 %v2276_v36, %v927_v19 }
  0x52   : > { %1596 = vst [vmem:[%s2283_s22 + $0xa0] sm:$0xff] %v1259_v48  ;;  %v932_v37 = vcvt.s32.f32 %v596_v27  ;;  %v598_v38 = vand.u32 255, %v262_v29  ;;  %v263_v39 = vunpack.c.3.s8 %v149_v5  ;;  %v1271_v41 = vmul.f32 %v2276_v36, %v928_v22 }
  0x53   : > { %1597 = vst.msk [vmem:[%s2283_s22 + $0xa8] sm:$0xff] %vm1576_vm0, %v1260_v56  ;;  %v1272_v42 = vmul.f32 %v2276_v36, %v929_v32  ;;  %v933_v43 = vcvt.s32.f32 %v597_v28  ;;  %v264_v44 = vunpack.c.0.s8 %v150_v30  ;;  %v1273_v45 = vmul.f32 %v2276_v36, %v930_v33 }
  0x54   : > { %1598 = vst [vmem:[%s2283_s22 + $0xb0] sm:$0xff] %v1261_v61  ;;  %v1274_v46 = vmul.f32 %v2276_v36, %v931_v34  ;;  %v934_v47 = vcvt.s32.f32 %v598_v38  ;;  %v599_v48 = vand.u32 255, %v263_v39  ;;  %v265_v50 = vunpack.c.0.s8 %v151_v40 }
  0x55   : > { %1599 = vst.msk [vmem:[%s2283_s22 + $0xb8] sm:$0xff] %vm1576_vm0, %v1262_v1  ;;  %v600_v49 = vand.u32 255, %v264_v44  ;;  %v266_v51 = vunpack.c.1.s8 %v150_v30  ;;  %v267_v52 = vunpack.c.1.s8 %v151_v40  ;;  %v1275_v53 = vmul.f32 %v2276_v36, %v932_v37  ;;  %v152_v1 = vld [vmem:[%s2265_s24 + $0x60] sm:$0xff] }
  0x56   : > { %1600 = vst [vmem:[%s2283_s22 + $0xc0] sm:$0xff] %v1263_v6  ;;  %v935_v54 = vcvt.s32.f32 %v599_v48  ;;  %v268_v55 = vunpack.c.2.s8 %v150_v30  ;;  %v269_v56 = vunpack.c.2.s8 %v151_v40  ;;  %v601_v58 = vand.u32 255, %v265_v50 }
  0x57   : > { %1601 = vst.msk [vmem:[%s2283_s22 + $0xc8] sm:$0xff] %vm1576_vm0, %v1264_v7  ;;  %v936_v57 = vcvt.s32.f32 %v600_v49  ;;  %v602_v59 = vand.u32 255, %v266_v51  ;;  %v603_v60 = vand.u32 255, %v267_v52  ;;  %v1276_v61 = vmul.f32 %v2276_v36, %v933_v43 }
  0x58   : > { %1602 = vst [vmem:[%s2283_s22 + $0xd0] sm:$0xff] %v1265_v10  ;;  %v604_v62 = vand.u32 255, %v268_v55  ;;  %v605_v63 = vand.u32 255, %v269_v56  ;;  %v270_v0 = vunpack.c.3.s8 %v150_v30  ;;  %v1277_v2 = vmul.f32 %v2276_v36, %v934_v47  ;;  %v153_v10 = vld [vmem:[%s2265_s24 + $0x68] sm:$0xff] }
  0x59   : > { %1603 = vst.msk [vmem:[%s2283_s22 + $0xd8] sm:$0xff] %vm1576_vm0, %v1266_v11  ;;  %v937_v3 = vcvt.s32.f32 %v601_v58  ;;  %v938_v4 = vcvt.s32.f32 %v602_v59  ;;  %v939_v5 = vcvt.s32.f32 %v603_v60  ;;  %v1278_v6 = vmul.f32 %v2276_v36, %v935_v54 }
  0x5a   : > { %1604 = vst [vmem:[%s2283_s22 + $0xe0] sm:$0xff] %v1267_v18  ;;  %v940_v7 = vcvt.s32.f32 %v604_v62  ;;  %v606_v8 = vand.u32 255, %v270_v0  ;;  %v271_v9 = vunpack.c.3.s8 %v151_v40  ;;  %v1279_v11 = vmul.f32 %v2276_v36, %v936_v57 }
  0x5b   : > { %1605 = vst.msk [vmem:[%s2283_s22 + $0xe8] sm:$0xff] %vm1576_vm0, %v1268_v26  ;;  %v1280_v12 = vmul.f32 %v2276_v36, %v937_v3  ;;  %v941_v13 = vcvt.s32.f32 %v605_v63  ;;  %v272_v14 = vunpack.c.0.s8 %v152_v1  ;;  %v1281_v15 = vmul.f32 %v2276_v36, %v938_v4 }
  0x5c   : > { %1606 = vst [vmem:[%s2283_s22 + $0xf0] sm:$0xff] %v1269_v31  ;;  %v1282_v16 = vmul.f32 %v2276_v36, %v939_v5  ;;  %v942_v17 = vcvt.s32.f32 %v606_v8  ;;  %v607_v18 = vand.u32 255, %v271_v9  ;;  %v273_v20 = vunpack.c.0.s8 %v153_v10 }
  0x5d   : > { %1607 = vst.msk [vmem:[%s2283_s22 + $0xf8] sm:$0xff] %vm1576_vm0, %v1270_v35  ;;  %v608_v19 = vand.u32 255, %v272_v14  ;;  %v274_v21 = vunpack.c.1.s8 %v152_v1  ;;  %v275_v22 = vunpack.c.1.s8 %v153_v10  ;;  %v1283_v23 = vmul.f32 %v2276_v36, %v940_v7  ;;  %v154_v35 = vld [vmem:[%s2265_s24 + $0x70] sm:$0xff] }
  0x5e   : > { %1608 = vst [vmem:[%s2283_s22 + $0x100] sm:$0xff] %v1271_v41  ;;  %v943_v24 = vcvt.s32.f32 %v607_v18  ;;  %v276_v25 = vunpack.c.2.s8 %v152_v1  ;;  %v277_v26 = vunpack.c.2.s8 %v153_v10  ;;  %v609_v28 = vand.u32 255, %v273_v20 }
  0x5f   : > { %1609 = vst.msk [vmem:[%s2283_s22 + $0x108] sm:$0xff] %vm1576_vm0, %v1272_v42  ;;  %v944_v27 = vcvt.s32.f32 %v608_v19  ;;  %v610_v29 = vand.u32 255, %v274_v21  ;;  %v611_v30 = vand.u32 255, %v275_v22  ;;  %v1284_v31 = vmul.f32 %v2276_v36, %v941_v13 }
  0x60   : > { %1610 = vst [vmem:[%s2283_s22 + $0x110] sm:$0xff] %v1273_v45  ;;  %v612_v32 = vand.u32 255, %v276_v25  ;;  %v613_v33 = vand.u32 255, %v277_v26  ;;  %v278_v34 = vunpack.c.3.s8 %v152_v1  ;;  %v1285_v37 = vmul.f32 %v2276_v36, %v942_v17  ;;  %v155_v45 = vld [vmem:[%s2265_s24 + $0x78] sm:$0xff] }
  0x61   : > { %1611 = vst.msk [vmem:[%s2283_s22 + $0x118] sm:$0xff] %vm1576_vm0, %v1274_v46  ;;  %v945_v38 = vcvt.s32.f32 %v609_v28  ;;  %v946_v39 = vcvt.s32.f32 %v610_v29  ;;  %v947_v40 = vcvt.s32.f32 %v611_v30  ;;  %v1286_v41 = vmul.f32 %v2276_v36, %v943_v24 }
  0x62   : > { %1612 = vst [vmem:[%s2283_s22 + $0x120] sm:$0xff] %v1275_v53  ;;  %v948_v42 = vcvt.s32.f32 %v612_v32  ;;  %v614_v43 = vand.u32 255, %v278_v34  ;;  %v279_v44 = vunpack.c.3.s8 %v153_v10  ;;  %v1287_v46 = vmul.f32 %v2276_v36, %v944_v27 }
  0x63   : > { %1613 = vst.msk [vmem:[%s2283_s22 + $0x128] sm:$0xff] %vm1576_vm0, %v1276_v61  ;;  %v1288_v47 = vmul.f32 %v2276_v36, %v945_v38  ;;  %v949_v48 = vcvt.s32.f32 %v613_v33  ;;  %v280_v49 = vunpack.c.0.s8 %v154_v35  ;;  %v1289_v50 = vmul.f32 %v2276_v36, %v946_v39 }
  0x64   : > { %1614 = vst [vmem:[%s2283_s22 + $0x130] sm:$0xff] %v1277_v2  ;;  %v1290_v51 = vmul.f32 %v2276_v36, %v947_v40  ;;  %v950_v52 = vcvt.s32.f32 %v614_v43  ;;  %v615_v53 = vand.u32 255, %v279_v44  ;;  %v281_v55 = vunpack.c.0.s8 %v155_v45 }
  0x65   : > { %1615 = vst.msk [vmem:[%s2283_s22 + $0x138] sm:$0xff] %vm1576_vm0, %v1278_v6  ;;  %v616_v54 = vand.u32 255, %v280_v49  ;;  %v282_v56 = vunpack.c.1.s8 %v154_v35  ;;  %v283_v57 = vunpack.c.1.s8 %v155_v45  ;;  %v1291_v58 = vmul.f32 %v2276_v36, %v948_v42  ;;  %v156_v6 = vld [vmem:[%s2265_s24 + $0x80] sm:$0xff] }
  0x66   : > { %1616 = vst [vmem:[%s2283_s22 + $0x140] sm:$0xff] %v1279_v11  ;;  %v951_v59 = vcvt.s32.f32 %v615_v53  ;;  %v284_v60 = vunpack.c.2.s8 %v154_v35  ;;  %v285_v61 = vunpack.c.2.s8 %v155_v45  ;;  %v617_v63 = vand.u32 255, %v281_v55 }
  0x67   : > { %1617 = vst.msk [vmem:[%s2283_s22 + $0x148] sm:$0xff] %vm1576_vm0, %v1280_v12  ;;  %v952_v62 = vcvt.s32.f32 %v616_v54  ;;  %v618_v0 = vand.u32 255, %v282_v56  ;;  %v619_v1 = vand.u32 255, %v283_v57  ;;  %v1292_v2 = vmul.f32 %v2276_v36, %v949_v48 }
  0x68   : > { %1618 = vst [vmem:[%s2283_s22 + $0x150] sm:$0xff] %v1281_v15  ;;  %v620_v3 = vand.u32 255, %v284_v60  ;;  %v621_v4 = vand.u32 255, %v285_v61  ;;  %v286_v5 = vunpack.c.3.s8 %v154_v35  ;;  %v1293_v7 = vmul.f32 %v2276_v36, %v950_v52  ;;  %v157_v15 = vld [vmem:[%s2265_s24 + $0x88] sm:$0xff] }
  0x69   : > { %1619 = vst.msk [vmem:[%s2283_s22 + $0x158] sm:$0xff] %vm1576_vm0, %v1282_v16  ;;  %v953_v8 = vcvt.s32.f32 %v617_v63  ;;  %v954_v9 = vcvt.s32.f32 %v618_v0  ;;  %v955_v10 = vcvt.s32.f32 %v619_v1  ;;  %v1294_v11 = vmul.f32 %v2276_v36, %v951_v59 }
  0x6a   : > { %1620 = vst [vmem:[%s2283_s22 + $0x160] sm:$0xff] %v1283_v23  ;;  %v956_v12 = vcvt.s32.f32 %v620_v3  ;;  %v622_v13 = vand.u32 255, %v286_v5  ;;  %v287_v14 = vunpack.c.3.s8 %v155_v45  ;;  %v1295_v16 = vmul.f32 %v2276_v36, %v952_v62 }
  0x6b   : > { %1621 = vst.msk [vmem:[%s2283_s22 + $0x168] sm:$0xff] %vm1576_vm0, %v1284_v31  ;;  %v1296_v17 = vmul.f32 %v2276_v36, %v953_v8  ;;  %v957_v18 = vcvt.s32.f32 %v621_v4  ;;  %v288_v19 = vunpack.c.0.s8 %v156_v6  ;;  %v1297_v20 = vmul.f32 %v2276_v36, %v954_v9 }
  0x6c   : > { %1622 = vst [vmem:[%s2283_s22 + $0x170] sm:$0xff] %v1285_v37  ;;  %v1298_v21 = vmul.f32 %v2276_v36, %v955_v10  ;;  %v958_v22 = vcvt.s32.f32 %v622_v13  ;;  %v623_v23 = vand.u32 255, %v287_v14  ;;  %v289_v25 = vunpack.c.0.s8 %v157_v15 }
  0x6d   : > { %1623 = vst.msk [vmem:[%s2283_s22 + $0x178] sm:$0xff] %vm1576_vm0, %v1286_v41  ;;  %v624_v24 = vand.u32 255, %v288_v19  ;;  %v290_v26 = vunpack.c.1.s8 %v156_v6  ;;  %v291_v27 = vunpack.c.1.s8 %v157_v15  ;;  %v1299_v28 = vmul.f32 %v2276_v36, %v956_v12  ;;  %v158_v41 = vld [vmem:[%s2265_s24 + $0x90] sm:$0xff] }
  0x6e   : > { %1624 = vst [vmem:[%s2283_s22 + $0x180] sm:$0xff] %v1287_v46  ;;  %v959_v29 = vcvt.s32.f32 %v623_v23  ;;  %v292_v30 = vunpack.c.2.s8 %v156_v6  ;;  %v293_v31 = vunpack.c.2.s8 %v157_v15  ;;  %v625_v33 = vand.u32 255, %v289_v25 }
  0x6f   : > { %1625 = vst.msk [vmem:[%s2283_s22 + $0x188] sm:$0xff] %vm1576_vm0, %v1288_v47  ;;  %v960_v32 = vcvt.s32.f32 %v624_v24  ;;  %v626_v34 = vand.u32 255, %v290_v26  ;;  %v627_v35 = vand.u32 255, %v291_v27  ;;  %v1300_v37 = vmul.f32 %v2276_v36, %v957_v18 }
  0x70   : > { %1626 = vst [vmem:[%s2283_s22 + $0x190] sm:$0xff] %v1289_v50  ;;  %v628_v38 = vand.u32 255, %v292_v30  ;;  %v629_v39 = vand.u32 255, %v293_v31  ;;  %v294_v40 = vunpack.c.3.s8 %v156_v6  ;;  %v1301_v42 = vmul.f32 %v2276_v36, %v958_v22  ;;  %v159_v50 = vld [vmem:[%s2265_s24 + $0x98] sm:$0xff] }
  0x71   : > { %1627 = vst.msk [vmem:[%s2283_s22 + $0x198] sm:$0xff] %vm1576_vm0, %v1290_v51  ;;  %v961_v43 = vcvt.s32.f32 %v625_v33  ;;  %v962_v44 = vcvt.s32.f32 %v626_v34  ;;  %v963_v45 = vcvt.s32.f32 %v627_v35  ;;  %v1302_v46 = vmul.f32 %v2276_v36, %v959_v29 }
  0x72   : > { %1628 = vst [vmem:[%s2283_s22 + $0x1a0] sm:$0xff] %v1291_v58  ;;  %v964_v47 = vcvt.s32.f32 %v628_v38  ;;  %v630_v48 = vand.u32 255, %v294_v40  ;;  %v295_v49 = vunpack.c.3.s8 %v157_v15  ;;  %v1303_v51 = vmul.f32 %v2276_v36, %v960_v32 }
  0x73   : > { %1629 = vst.msk [vmem:[%s2283_s22 + $0x1a8] sm:$0xff] %vm1576_vm0, %v1292_v2  ;;  %v1304_v52 = vmul.f32 %v2276_v36, %v961_v43  ;;  %v965_v53 = vcvt.s32.f32 %v629_v39  ;;  %v296_v54 = vunpack.c.0.s8 %v158_v41  ;;  %v1305_v55 = vmul.f32 %v2276_v36, %v962_v44 }
  0x74   : > { %1630 = vst [vmem:[%s2283_s22 + $0x1b0] sm:$0xff] %v1293_v7  ;;  %v1306_v56 = vmul.f32 %v2276_v36, %v963_v45  ;;  %v966_v57 = vcvt.s32.f32 %v630_v48  ;;  %v631_v58 = vand.u32 255, %v295_v49  ;;  %v297_v60 = vunpack.c.0.s8 %v159_v50 }
  0x75   : > { %1631 = vst.msk [vmem:[%s2283_s22 + $0x1b8] sm:$0xff] %vm1576_vm0, %v1294_v11  ;;  %v632_v59 = vand.u32 255, %v296_v54  ;;  %v298_v61 = vunpack.c.1.s8 %v158_v41  ;;  %v299_v62 = vunpack.c.1.s8 %v159_v50  ;;  %v1307_v63 = vmul.f32 %v2276_v36, %v964_v47  ;;  %v160_v11 = vld [vmem:[%s2265_s24 + $0xa0] sm:$0xff] }
  0x76   : > { %1632 = vst [vmem:[%s2283_s22 + $0x1c0] sm:$0xff] %v1295_v16  ;;  %v967_v0 = vcvt.s32.f32 %v631_v58  ;;  %v300_v1 = vunpack.c.2.s8 %v158_v41  ;;  %v301_v2 = vunpack.c.2.s8 %v159_v50  ;;  %v633_v4 = vand.u32 255, %v297_v60 }
  0x77   : > { %1633 = vst.msk [vmem:[%s2283_s22 + $0x1c8] sm:$0xff] %vm1576_vm0, %v1296_v17  ;;  %v968_v3 = vcvt.s32.f32 %v632_v59  ;;  %v634_v5 = vand.u32 255, %v298_v61  ;;  %v635_v6 = vand.u32 255, %v299_v62  ;;  %v1308_v7 = vmul.f32 %v2276_v36, %v965_v53 }
  0x78   : > { %1634 = vst [vmem:[%s2283_s22 + $0x1d0] sm:$0xff] %v1297_v20  ;;  %v636_v8 = vand.u32 255, %v300_v1  ;;  %v637_v9 = vand.u32 255, %v301_v2  ;;  %v302_v10 = vunpack.c.3.s8 %v158_v41  ;;  %v1309_v12 = vmul.f32 %v2276_v36, %v966_v57  ;;  %v161_v20 = vld [vmem:[%s2265_s24 + $0xa8] sm:$0xff] }
  0x79   : > { %1635 = vst.msk [vmem:[%s2283_s22 + $0x1d8] sm:$0xff] %vm1576_vm0, %v1298_v21  ;;  %v969_v13 = vcvt.s32.f32 %v633_v4  ;;  %v970_v14 = vcvt.s32.f32 %v634_v5  ;;  %v971_v15 = vcvt.s32.f32 %v635_v6  ;;  %v1310_v16 = vmul.f32 %v2276_v36, %v967_v0 }
  0x7a   : > { %1636 = vst [vmem:[%s2283_s22 + $0x1e0] sm:$0xff] %v1299_v28  ;;  %v972_v17 = vcvt.s32.f32 %v636_v8  ;;  %v638_v18 = vand.u32 255, %v302_v10  ;;  %v303_v19 = vunpack.c.3.s8 %v159_v50  ;;  %v1311_v21 = vmul.f32 %v2276_v36, %v968_v3 }
  0x7b   : > { %1637 = vst.msk [vmem:[%s2283_s22 + $0x1e8] sm:$0xff] %vm1576_vm0, %v1300_v37  ;;  %v1312_v22 = vmul.f32 %v2276_v36, %v969_v13  ;;  %v973_v23 = vcvt.s32.f32 %v637_v9  ;;  %v304_v24 = vunpack.c.0.s8 %v160_v11  ;;  %v1313_v25 = vmul.f32 %v2276_v36, %v970_v14 }
  0x7c   : > { %1638 = vst [vmem:[%s2283_s22 + $0x1f0] sm:$0xff] %v1301_v42  ;;  %v1314_v26 = vmul.f32 %v2276_v36, %v971_v15  ;;  %v974_v27 = vcvt.s32.f32 %v638_v18  ;;  %v639_v28 = vand.u32 255, %v303_v19  ;;  %v305_v30 = vunpack.c.0.s8 %v161_v20 }
  0x7d   : > { %1639 = vst.msk [vmem:[%s2283_s22 + $0x1f8] sm:$0xff] %vm1576_vm0, %v1302_v46  ;;  %v640_v29 = vand.u32 255, %v304_v24  ;;  %v306_v31 = vunpack.c.1.s8 %v160_v11  ;;  %v307_v32 = vunpack.c.1.s8 %v161_v20  ;;  %v1315_v33 = vmul.f32 %v2276_v36, %v972_v17  ;;  %v162_v46 = vld [vmem:[%s2265_s24 + $0xb0] sm:$0xff] }
  0x7e   : > { %1640 = vst [vmem:[%s2283_s22 + $0x200] sm:$0xff] %v1303_v51  ;;  %v975_v34 = vcvt.s32.f32 %v639_v28  ;;  %v308_v35 = vunpack.c.2.s8 %v160_v11  ;;  %v309_v37 = vunpack.c.2.s8 %v161_v20  ;;  %v641_v39 = vand.u32 255, %v305_v30 }
  0x7f   : > { %1641 = vst.msk [vmem:[%s2283_s22 + $0x208] sm:$0xff] %vm1576_vm0, %v1304_v52  ;;  %v976_v38 = vcvt.s32.f32 %v640_v29  ;;  %v642_v40 = vand.u32 255, %v306_v31  ;;  %v643_v41 = vand.u32 255, %v307_v32  ;;  %v1316_v42 = vmul.f32 %v2276_v36, %v973_v23 }
  0x80   : > { %1642 = vst [vmem:[%s2283_s22 + $0x210] sm:$0xff] %v1305_v55  ;;  %v644_v43 = vand.u32 255, %v308_v35  ;;  %v645_v44 = vand.u32 255, %v309_v37  ;;  %v310_v45 = vunpack.c.3.s8 %v160_v11  ;;  %v1317_v47 = vmul.f32 %v2276_v36, %v974_v27  ;;  %v163_v55 = vld [vmem:[%s2265_s24 + $0xb8] sm:$0xff] }
  0x81   : > { %1643 = vst.msk [vmem:[%s2283_s22 + $0x218] sm:$0xff] %vm1576_vm0, %v1306_v56  ;;  %v977_v48 = vcvt.s32.f32 %v641_v39  ;;  %v978_v49 = vcvt.s32.f32 %v642_v40  ;;  %v979_v50 = vcvt.s32.f32 %v643_v41  ;;  %v1318_v51 = vmul.f32 %v2276_v36, %v975_v34 }
  0x82   : > { %1644 = vst [vmem:[%s2283_s22 + $0x220] sm:$0xff] %v1307_v63  ;;  %v980_v52 = vcvt.s32.f32 %v644_v43  ;;  %v646_v53 = vand.u32 255, %v310_v45  ;;  %v311_v54 = vunpack.c.3.s8 %v161_v20  ;;  %v1319_v56 = vmul.f32 %v2276_v36, %v976_v38 }
  0x83   : > { %1645 = vst.msk [vmem:[%s2283_s22 + $0x228] sm:$0xff] %vm1576_vm0, %v1308_v7  ;;  %v1320_v57 = vmul.f32 %v2276_v36, %v977_v48  ;;  %v981_v58 = vcvt.s32.f32 %v645_v44  ;;  %v312_v59 = vunpack.c.0.s8 %v162_v46  ;;  %v1321_v60 = vmul.f32 %v2276_v36, %v978_v49 }
  0x84   : > { %1646 = vst [vmem:[%s2283_s22 + $0x230] sm:$0xff] %v1309_v12  ;;  %v1322_v61 = vmul.f32 %v2276_v36, %v979_v50  ;;  %v982_v62 = vcvt.s32.f32 %v646_v53  ;;  %v647_v63 = vand.u32 255, %v311_v54  ;;  %v313_v1 = vunpack.c.0.s8 %v163_v55 }
  0x85   : > { %1647 = vst.msk [vmem:[%s2283_s22 + $0x238] sm:$0xff] %vm1576_vm0, %v1310_v16  ;;  %v648_v0 = vand.u32 255, %v312_v59  ;;  %v314_v2 = vunpack.c.1.s8 %v162_v46  ;;  %v315_v3 = vunpack.c.1.s8 %v163_v55  ;;  %v1323_v4 = vmul.f32 %v2276_v36, %v980_v52  ;;  %v164_v16 = vld [vmem:[%s2265_s24 + $0xc0] sm:$0xff] }
  0x86   : > { %1648 = vst [vmem:[%s2283_s22 + $0x240] sm:$0xff] %v1311_v21  ;;  %v983_v5 = vcvt.s32.f32 %v647_v63  ;;  %v316_v6 = vunpack.c.2.s8 %v162_v46  ;;  %v317_v7 = vunpack.c.2.s8 %v163_v55  ;;  %v649_v9 = vand.u32 255, %v313_v1 }
  0x87   : > { %1649 = vst.msk [vmem:[%s2283_s22 + $0x248] sm:$0xff] %vm1576_vm0, %v1312_v22  ;;  %v984_v8 = vcvt.s32.f32 %v648_v0  ;;  %v650_v10 = vand.u32 255, %v314_v2  ;;  %v651_v11 = vand.u32 255, %v315_v3  ;;  %v1324_v12 = vmul.f32 %v2276_v36, %v981_v58 }
  0x88   : > { %1650 = vst [vmem:[%s2283_s22 + $0x250] sm:$0xff] %v1313_v25  ;;  %v652_v13 = vand.u32 255, %v316_v6  ;;  %v653_v14 = vand.u32 255, %v317_v7  ;;  %v318_v15 = vunpack.c.3.s8 %v162_v46  ;;  %v1325_v17 = vmul.f32 %v2276_v36, %v982_v62  ;;  %v165_v25 = vld [vmem:[%s2265_s24 + $0xc8] sm:$0xff] }
  0x89   : > { %1651 = vst.msk [vmem:[%s2283_s22 + $0x258] sm:$0xff] %vm1576_vm0, %v1314_v26  ;;  %v985_v18 = vcvt.s32.f32 %v649_v9  ;;  %v986_v19 = vcvt.s32.f32 %v650_v10  ;;  %v987_v20 = vcvt.s32.f32 %v651_v11  ;;  %v1326_v21 = vmul.f32 %v2276_v36, %v983_v5 }
  0x8a   : > { %1652 = vst [vmem:[%s2283_s22 + $0x260] sm:$0xff] %v1315_v33  ;;  %v988_v22 = vcvt.s32.f32 %v652_v13  ;;  %v654_v23 = vand.u32 255, %v318_v15  ;;  %v319_v24 = vunpack.c.3.s8 %v163_v55  ;;  %v1327_v26 = vmul.f32 %v2276_v36, %v984_v8 }
  0x8b   : > { %1653 = vst.msk [vmem:[%s2283_s22 + $0x268] sm:$0xff] %vm1576_vm0, %v1316_v42  ;;  %v1328_v27 = vmul.f32 %v2276_v36, %v985_v18  ;;  %v989_v28 = vcvt.s32.f32 %v653_v14  ;;  %v320_v29 = vunpack.c.0.s8 %v164_v16  ;;  %v1329_v30 = vmul.f32 %v2276_v36, %v986_v19 }
  0x8c   : > { %1654 = vst [vmem:[%s2283_s22 + $0x270] sm:$0xff] %v1317_v47  ;;  %v1330_v31 = vmul.f32 %v2276_v36, %v987_v20  ;;  %v990_v32 = vcvt.s32.f32 %v654_v23  ;;  %v655_v33 = vand.u32 255, %v319_v24  ;;  %v321_v35 = vunpack.c.0.s8 %v165_v25 }
  0x8d   : > { %1655 = vst.msk [vmem:[%s2283_s22 + $0x278] sm:$0xff] %vm1576_vm0, %v1318_v51  ;;  %v656_v34 = vand.u32 255, %v320_v29  ;;  %v322_v37 = vunpack.c.1.s8 %v164_v16  ;;  %v323_v38 = vunpack.c.1.s8 %v165_v25  ;;  %v1331_v39 = vmul.f32 %v2276_v36, %v988_v22  ;;  %v166_v51 = vld [vmem:[%s2265_s24 + $0xd0] sm:$0xff] }
  0x8e   : > { %1656 = vst [vmem:[%s2283_s22 + $0x280] sm:$0xff] %v1319_v56  ;;  %v991_v40 = vcvt.s32.f32 %v655_v33  ;;  %v324_v41 = vunpack.c.2.s8 %v164_v16  ;;  %v325_v42 = vunpack.c.2.s8 %v165_v25  ;;  %v657_v44 = vand.u32 255, %v321_v35 }
  0x8f   : > { %1657 = vst.msk [vmem:[%s2283_s22 + $0x288] sm:$0xff] %vm1576_vm0, %v1320_v57  ;;  %v992_v43 = vcvt.s32.f32 %v656_v34  ;;  %v658_v45 = vand.u32 255, %v322_v37  ;;  %v659_v46 = vand.u32 255, %v323_v38  ;;  %v1332_v47 = vmul.f32 %v2276_v36, %v989_v28 }
  0x90   : > { %1658 = vst [vmem:[%s2283_s22 + $0x290] sm:$0xff] %v1321_v60  ;;  %v660_v48 = vand.u32 255, %v324_v41  ;;  %v661_v49 = vand.u32 255, %v325_v42  ;;  %v326_v50 = vunpack.c.3.s8 %v164_v16  ;;  %v1333_v52 = vmul.f32 %v2276_v36, %v990_v32  ;;  %v167_v60 = vld [vmem:[%s2265_s24 + $0xd8] sm:$0xff] }
  0x91   : > { %1659 = vst.msk [vmem:[%s2283_s22 + $0x298] sm:$0xff] %vm1576_vm0, %v1322_v61  ;;  %v993_v53 = vcvt.s32.f32 %v657_v44  ;;  %v994_v54 = vcvt.s32.f32 %v658_v45  ;;  %v995_v55 = vcvt.s32.f32 %v659_v46  ;;  %v1334_v56 = vmul.f32 %v2276_v36, %v991_v40 }
  0x92   : > { %1660 = vst [vmem:[%s2283_s22 + $0x2a0] sm:$0xff] %v1323_v4  ;;  %v996_v57 = vcvt.s32.f32 %v660_v48  ;;  %v662_v58 = vand.u32 255, %v326_v50  ;;  %v327_v59 = vunpack.c.3.s8 %v165_v25  ;;  %v1335_v61 = vmul.f32 %v2276_v36, %v992_v43 }
  0x93   : > { %1661 = vst.msk [vmem:[%s2283_s22 + $0x2a8] sm:$0xff] %vm1576_vm0, %v1324_v12  ;;  %v1336_v62 = vmul.f32 %v2276_v36, %v993_v53  ;;  %v997_v63 = vcvt.s32.f32 %v661_v49  ;;  %v328_v0 = vunpack.c.0.s8 %v166_v51  ;;  %v1337_v1 = vmul.f32 %v2276_v36, %v994_v54 }
  0x94   : > { %1662 = vst [vmem:[%s2283_s22 + $0x2b0] sm:$0xff] %v1325_v17  ;;  %v1338_v2 = vmul.f32 %v2276_v36, %v995_v55  ;;  %v998_v3 = vcvt.s32.f32 %v662_v58  ;;  %v663_v4 = vand.u32 255, %v327_v59  ;;  %v329_v6 = vunpack.c.0.s8 %v167_v60 }
  0x95   : > { %1663 = vst.msk [vmem:[%s2283_s22 + $0x2b8] sm:$0xff] %vm1576_vm0, %v1326_v21  ;;  %v664_v5 = vand.u32 255, %v328_v0  ;;  %v330_v7 = vunpack.c.1.s8 %v166_v51  ;;  %v331_v8 = vunpack.c.1.s8 %v167_v60  ;;  %v1339_v9 = vmul.f32 %v2276_v36, %v996_v57  ;;  %v168_v21 = vld [vmem:[%s2265_s24 + $0xe0] sm:$0xff] }
  0x96   : > { %1664 = vst [vmem:[%s2283_s22 + $0x2c0] sm:$0xff] %v1327_v26  ;;  %v999_v10 = vcvt.s32.f32 %v663_v4  ;;  %v332_v11 = vunpack.c.2.s8 %v166_v51  ;;  %v333_v12 = vunpack.c.2.s8 %v167_v60  ;;  %v665_v14 = vand.u32 255, %v329_v6 }
  0x97   : > { %1665 = vst.msk [vmem:[%s2283_s22 + $0x2c8] sm:$0xff] %vm1576_vm0, %v1328_v27  ;;  %v1000_v13 = vcvt.s32.f32 %v664_v5  ;;  %v666_v15 = vand.u32 255, %v330_v7  ;;  %v667_v16 = vand.u32 255, %v331_v8  ;;  %v1340_v17 = vmul.f32 %v2276_v36, %v997_v63 }
  0x98   : > { %1666 = vst [vmem:[%s2283_s22 + $0x2d0] sm:$0xff] %v1329_v30  ;;  %v668_v18 = vand.u32 255, %v332_v11  ;;  %v669_v19 = vand.u32 255, %v333_v12  ;;  %v334_v20 = vunpack.c.3.s8 %v166_v51  ;;  %v1341_v22 = vmul.f32 %v2276_v36, %v998_v3  ;;  %v169_v30 = vld [vmem:[%s2265_s24 + $0xe8] sm:$0xff] }
  0x99   : > { %1667 = vst.msk [vmem:[%s2283_s22 + $0x2d8] sm:$0xff] %vm1576_vm0, %v1330_v31  ;;  %v1001_v23 = vcvt.s32.f32 %v665_v14  ;;  %v1002_v24 = vcvt.s32.f32 %v666_v15  ;;  %v1003_v25 = vcvt.s32.f32 %v667_v16  ;;  %v1342_v26 = vmul.f32 %v2276_v36, %v999_v10 }
  0x9a   : > { %1668 = vst [vmem:[%s2283_s22 + $0x2e0] sm:$0xff] %v1331_v39  ;;  %v1004_v27 = vcvt.s32.f32 %v668_v18  ;;  %v670_v28 = vand.u32 255, %v334_v20  ;;  %v335_v29 = vunpack.c.3.s8 %v167_v60  ;;  %v1343_v31 = vmul.f32 %v2276_v36, %v1000_v13 }
  0x9b   : > { %1669 = vst.msk [vmem:[%s2283_s22 + $0x2e8] sm:$0xff] %vm1576_vm0, %v1332_v47  ;;  %v1344_v32 = vmul.f32 %v2276_v36, %v1001_v23  ;;  %v1005_v33 = vcvt.s32.f32 %v669_v19  ;;  %v336_v34 = vunpack.c.0.s8 %v168_v21  ;;  %v1345_v35 = vmul.f32 %v2276_v36, %v1002_v24 }
  0x9c   : > { %1670 = vst [vmem:[%s2283_s22 + $0x2f0] sm:$0xff] %v1333_v52  ;;  %v1346_v37 = vmul.f32 %v2276_v36, %v1003_v25  ;;  %v1006_v38 = vcvt.s32.f32 %v670_v28  ;;  %v671_v39 = vand.u32 255, %v335_v29  ;;  %v337_v41 = vunpack.c.0.s8 %v169_v30 }
  0x9d   : > { %1671 = vst.msk [vmem:[%s2283_s22 + $0x2f8] sm:$0xff] %vm1576_vm0, %v1334_v56  ;;  %v672_v40 = vand.u32 255, %v336_v34  ;;  %v338_v42 = vunpack.c.1.s8 %v168_v21  ;;  %v339_v43 = vunpack.c.1.s8 %v169_v30  ;;  %v1347_v44 = vmul.f32 %v2276_v36, %v1004_v27  ;;  %v170_v56 = vld [vmem:[%s2265_s24 + $0xf0] sm:$0xff] }
  0x9e   : > { %1672 = vst [vmem:[%s2283_s22 + $0x300] sm:$0xff] %v1335_v61  ;;  %v1007_v45 = vcvt.s32.f32 %v671_v39  ;;  %v340_v46 = vunpack.c.2.s8 %v168_v21  ;;  %v341_v47 = vunpack.c.2.s8 %v169_v30  ;;  %v673_v49 = vand.u32 255, %v337_v41 }
  0x9f   : > { %1673 = vst.msk [vmem:[%s2283_s22 + $0x308] sm:$0xff] %vm1576_vm0, %v1336_v62  ;;  %v1008_v48 = vcvt.s32.f32 %v672_v40  ;;  %v674_v50 = vand.u32 255, %v338_v42  ;;  %v675_v51 = vand.u32 255, %v339_v43  ;;  %v1348_v52 = vmul.f32 %v2276_v36, %v1005_v33 }
  0xa0   : > { %1674 = vst [vmem:[%s2283_s22 + $0x310] sm:$0xff] %v1337_v1  ;;  %v676_v53 = vand.u32 255, %v340_v46  ;;  %v677_v54 = vand.u32 255, %v341_v47  ;;  %v342_v55 = vunpack.c.3.s8 %v168_v21  ;;  %v1349_v57 = vmul.f32 %v2276_v36, %v1006_v38  ;;  %v171_v1 = vld [vmem:[%s2265_s24 + $0xf8] sm:$0xff] }
  0xa1   : > { %1675 = vst.msk [vmem:[%s2283_s22 + $0x318] sm:$0xff] %vm1576_vm0, %v1338_v2  ;;  %v1009_v58 = vcvt.s32.f32 %v673_v49  ;;  %v1010_v59 = vcvt.s32.f32 %v674_v50  ;;  %v1011_v60 = vcvt.s32.f32 %v675_v51  ;;  %v1350_v61 = vmul.f32 %v2276_v36, %v1007_v45 }
  0xa2   : > { %1676 = vst [vmem:[%s2283_s22 + $0x320] sm:$0xff] %v1339_v9  ;;  %v1012_v62 = vcvt.s32.f32 %v676_v53  ;;  %v678_v63 = vand.u32 255, %v342_v55  ;;  %v343_v0 = vunpack.c.3.s8 %v169_v30  ;;  %v1351_v2 = vmul.f32 %v2276_v36, %v1008_v48 }
  0xa3   : > { %1677 = vst.msk [vmem:[%s2283_s22 + $0x328] sm:$0xff] %vm1576_vm0, %v1340_v17  ;;  %v1352_v3 = vmul.f32 %v2276_v36, %v1009_v58  ;;  %v1013_v4 = vcvt.s32.f32 %v677_v54  ;;  %v344_v5 = vunpack.c.0.s8 %v170_v56  ;;  %v1353_v6 = vmul.f32 %v2276_v36, %v1010_v59 }
  0xa4   : > { %1678 = vst [vmem:[%s2283_s22 + $0x330] sm:$0xff] %v1341_v22  ;;  %v1354_v7 = vmul.f32 %v2276_v36, %v1011_v60  ;;  %v1014_v8 = vcvt.s32.f32 %v678_v63  ;;  %v679_v9 = vand.u32 255, %v343_v0  ;;  %v345_v11 = vunpack.c.0.s8 %v171_v1 }
  0xa5   : > { %1679 = vst.msk [vmem:[%s2283_s22 + $0x338] sm:$0xff] %vm1576_vm0, %v1342_v26  ;;  %v680_v10 = vand.u32 255, %v344_v5  ;;  %v346_v12 = vunpack.c.1.s8 %v170_v56  ;;  %v347_v13 = vunpack.c.1.s8 %v171_v1  ;;  %v1355_v14 = vmul.f32 %v2276_v36, %v1012_v62  ;;  %v172_v26 = vld [vmem:[%s2265_s24 + $0x100] sm:$0xff] }
  0xa6   : > { %1680 = vst [vmem:[%s2283_s22 + $0x340] sm:$0xff] %v1343_v31  ;;  %v1015_v15 = vcvt.s32.f32 %v679_v9  ;;  %v348_v16 = vunpack.c.2.s8 %v170_v56  ;;  %v349_v17 = vunpack.c.2.s8 %v171_v1  ;;  %v681_v19 = vand.u32 255, %v345_v11 }
  0xa7   : > { %1681 = vst.msk [vmem:[%s2283_s22 + $0x348] sm:$0xff] %vm1576_vm0, %v1344_v32  ;;  %v1016_v18 = vcvt.s32.f32 %v680_v10  ;;  %v682_v20 = vand.u32 255, %v346_v12  ;;  %v683_v21 = vand.u32 255, %v347_v13  ;;  %v1356_v22 = vmul.f32 %v2276_v36, %v1013_v4 }
  0xa8   : > { %1682 = vst [vmem:[%s2283_s22 + $0x350] sm:$0xff] %v1345_v35  ;;  %v684_v23 = vand.u32 255, %v348_v16  ;;  %v685_v24 = vand.u32 255, %v349_v17  ;;  %v350_v25 = vunpack.c.3.s8 %v170_v56  ;;  %v1357_v27 = vmul.f32 %v2276_v36, %v1014_v8  ;;  %v173_v35 = vld [vmem:[%s2265_s24 + $0x108] sm:$0xff] }
  0xa9   : > { %1683 = vst.msk [vmem:[%s2283_s22 + $0x358] sm:$0xff] %vm1576_vm0, %v1346_v37  ;;  %v1017_v28 = vcvt.s32.f32 %v681_v19  ;;  %v1018_v29 = vcvt.s32.f32 %v682_v20  ;;  %v1019_v30 = vcvt.s32.f32 %v683_v21  ;;  %v1358_v31 = vmul.f32 %v2276_v36, %v1015_v15 }
  0xaa   : > { %1684 = vst [vmem:[%s2283_s22 + $0x360] sm:$0xff] %v1347_v44  ;;  %v1020_v32 = vcvt.s32.f32 %v684_v23  ;;  %v686_v33 = vand.u32 255, %v350_v25  ;;  %v351_v34 = vunpack.c.3.s8 %v171_v1  ;;  %v1359_v37 = vmul.f32 %v2276_v36, %v1016_v18 }
  0xab   : > { %1685 = vst.msk [vmem:[%s2283_s22 + $0x368] sm:$0xff] %vm1576_vm0, %v1348_v52  ;;  %v1360_v38 = vmul.f32 %v2276_v36, %v1017_v28  ;;  %v1021_v39 = vcvt.s32.f32 %v685_v24  ;;  %v352_v40 = vunpack.c.0.s8 %v172_v26  ;;  %v1361_v41 = vmul.f32 %v2276_v36, %v1018_v29 }
  0xac   : > { %1686 = vst [vmem:[%s2283_s22 + $0x370] sm:$0xff] %v1349_v57  ;;  %v1362_v42 = vmul.f32 %v2276_v36, %v1019_v30  ;;  %v1022_v43 = vcvt.s32.f32 %v686_v33  ;;  %v687_v44 = vand.u32 255, %v351_v34  ;;  %v353_v46 = vunpack.c.0.s8 %v173_v35 }
  0xad   : > { %1687 = vst.msk [vmem:[%s2283_s22 + $0x378] sm:$0xff] %vm1576_vm0, %v1350_v61  ;;  %v688_v45 = vand.u32 255, %v352_v40  ;;  %v354_v47 = vunpack.c.1.s8 %v172_v26  ;;  %v355_v48 = vunpack.c.1.s8 %v173_v35  ;;  %v1363_v49 = vmul.f32 %v2276_v36, %v1020_v32  ;;  %v174_v61 = vld [vmem:[%s2265_s24 + $0x110] sm:$0xff] }
  0xae   : > { %1688 = vst [vmem:[%s2283_s22 + $0x380] sm:$0xff] %v1351_v2  ;;  %v1023_v50 = vcvt.s32.f32 %v687_v44  ;;  %v356_v51 = vunpack.c.2.s8 %v172_v26  ;;  %v357_v52 = vunpack.c.2.s8 %v173_v35  ;;  %v689_v54 = vand.u32 255, %v353_v46 }
  0xaf   : > { %1689 = vst.msk [vmem:[%s2283_s22 + $0x388] sm:$0xff] %vm1576_vm0, %v1352_v3  ;;  %v1024_v53 = vcvt.s32.f32 %v688_v45  ;;  %v690_v55 = vand.u32 255, %v354_v47  ;;  %v691_v56 = vand.u32 255, %v355_v48  ;;  %v1364_v57 = vmul.f32 %v2276_v36, %v1021_v39 }
  0xb0   : > { %1690 = vst [vmem:[%s2283_s22 + $0x390] sm:$0xff] %v1353_v6  ;;  %v692_v58 = vand.u32 255, %v356_v51  ;;  %v693_v59 = vand.u32 255, %v357_v52  ;;  %v358_v60 = vunpack.c.3.s8 %v172_v26  ;;  %v1365_v62 = vmul.f32 %v2276_v36, %v1022_v43  ;;  %v175_v6 = vld [vmem:[%s2265_s24 + $0x118] sm:$0xff] }
  0xb1   : > { %1691 = vst.msk [vmem:[%s2283_s22 + $0x398] sm:$0xff] %vm1576_vm0, %v1354_v7  ;;  %v1025_v63 = vcvt.s32.f32 %v689_v54  ;;  %v1026_v0 = vcvt.s32.f32 %v690_v55  ;;  %v1027_v1 = vcvt.s32.f32 %v691_v56  ;;  %v1366_v2 = vmul.f32 %v2276_v36, %v1023_v50 }
  0xb2   : > { %1692 = vst [vmem:[%s2283_s22 + $0x3a0] sm:$0xff] %v1355_v14  ;;  %v1028_v3 = vcvt.s32.f32 %v692_v58  ;;  %v694_v4 = vand.u32 255, %v358_v60  ;;  %v359_v5 = vunpack.c.3.s8 %v173_v35  ;;  %v1367_v7 = vmul.f32 %v2276_v36, %v1024_v53 }
  0xb3   : > { %1693 = vst.msk [vmem:[%s2283_s22 + $0x3a8] sm:$0xff] %vm1576_vm0, %v1356_v22  ;;  %v1368_v8 = vmul.f32 %v2276_v36, %v1025_v63  ;;  %v1029_v9 = vcvt.s32.f32 %v693_v59  ;;  %v360_v10 = vunpack.c.0.s8 %v174_v61  ;;  %v1369_v11 = vmul.f32 %v2276_v36, %v1026_v0 }
  0xb4   : > { %1694 = vst [vmem:[%s2283_s22 + $0x3b0] sm:$0xff] %v1357_v27  ;;  %v1370_v12 = vmul.f32 %v2276_v36, %v1027_v1  ;;  %v1030_v13 = vcvt.s32.f32 %v694_v4  ;;  %v695_v14 = vand.u32 255, %v359_v5  ;;  %v361_v16 = vunpack.c.0.s8 %v175_v6 }
  0xb5   : > { %1695 = vst.msk [vmem:[%s2283_s22 + $0x3b8] sm:$0xff] %vm1576_vm0, %v1358_v31  ;;  %v696_v15 = vand.u32 255, %v360_v10  ;;  %v362_v17 = vunpack.c.1.s8 %v174_v61  ;;  %v363_v18 = vunpack.c.1.s8 %v175_v6  ;;  %v1371_v19 = vmul.f32 %v2276_v36, %v1028_v3  ;;  %v176_v31 = vld [vmem:[%s2265_s24 + $0x120] sm:$0xff] }
  0xb6   : > { %1696 = vst [vmem:[%s2283_s22 + $0x3c0] sm:$0xff] %v1359_v37  ;;  %v1031_v20 = vcvt.s32.f32 %v695_v14  ;;  %v364_v21 = vunpack.c.2.s8 %v174_v61  ;;  %v365_v22 = vunpack.c.2.s8 %v175_v6  ;;  %v697_v24 = vand.u32 255, %v361_v16 }
  0xb7   : > { %1697 = vst.msk [vmem:[%s2283_s22 + $0x3c8] sm:$0xff] %vm1576_vm0, %v1360_v38  ;;  %v1032_v23 = vcvt.s32.f32 %v696_v15  ;;  %v698_v25 = vand.u32 255, %v362_v17  ;;  %v699_v26 = vand.u32 255, %v363_v18  ;;  %v1372_v27 = vmul.f32 %v2276_v36, %v1029_v9 }
  0xb8   : > { %1698 = vst [vmem:[%s2283_s22 + $0x3d0] sm:$0xff] %v1361_v41  ;;  %v700_v28 = vand.u32 255, %v364_v21  ;;  %v701_v29 = vand.u32 255, %v365_v22  ;;  %v366_v30 = vunpack.c.3.s8 %v174_v61  ;;  %v1373_v32 = vmul.f32 %v2276_v36, %v1030_v13  ;;  %v177_v41 = vld [vmem:[%s2265_s24 + $0x128] sm:$0xff] }
  0xb9   : > { %1699 = vst.msk [vmem:[%s2283_s22 + $0x3d8] sm:$0xff] %vm1576_vm0, %v1362_v42  ;;  %v1033_v33 = vcvt.s32.f32 %v697_v24  ;;  %v1034_v34 = vcvt.s32.f32 %v698_v25  ;;  %v1035_v35 = vcvt.s32.f32 %v699_v26  ;;  %v1374_v37 = vmul.f32 %v2276_v36, %v1031_v20 }
  0xba   : > { %1700 = vst [vmem:[%s2283_s22 + $0x3e0] sm:$0xff] %v1363_v49  ;;  %v1036_v38 = vcvt.s32.f32 %v700_v28  ;;  %v702_v39 = vand.u32 255, %v366_v30  ;;  %v367_v40 = vunpack.c.3.s8 %v175_v6  ;;  %v1375_v42 = vmul.f32 %v2276_v36, %v1032_v23 }
  0xbb   : > { %1701 = vst.msk [vmem:[%s2283_s22 + $0x3e8] sm:$0xff] %vm1576_vm0, %v1364_v57  ;;  %v1376_v43 = vmul.f32 %v2276_v36, %v1033_v33  ;;  %v1037_v44 = vcvt.s32.f32 %v701_v29  ;;  %v368_v45 = vunpack.c.0.s8 %v176_v31  ;;  %v1377_v46 = vmul.f32 %v2276_v36, %v1034_v34 }
  0xbc   : > { %1702 = vst [vmem:[%s2283_s22 + $0x3f0] sm:$0xff] %v1365_v62  ;;  %v1378_v47 = vmul.f32 %v2276_v36, %v1035_v35  ;;  %v1038_v48 = vcvt.s32.f32 %v702_v39  ;;  %v703_v49 = vand.u32 255, %v367_v40  ;;  %v369_v51 = vunpack.c.0.s8 %v177_v41 }
  0xbd   : > { %1703 = vst.msk [vmem:[%s2283_s22 + $0x3f8] sm:$0xff] %vm1576_vm0, %v1366_v2  ;;  %v704_v50 = vand.u32 255, %v368_v45  ;;  %v370_v52 = vunpack.c.1.s8 %v176_v31  ;;  %v371_v53 = vunpack.c.1.s8 %v177_v41  ;;  %v1379_v54 = vmul.f32 %v2276_v36, %v1036_v38  ;;  %v178_v2 = vld [vmem:[%s2265_s24 + $0x130] sm:$0xff] }
  0xbe   : > { %1704 = vst [vmem:[%s2283_s22 + $0x400] sm:$0xff] %v1367_v7  ;;  %v1039_v55 = vcvt.s32.f32 %v703_v49  ;;  %v372_v56 = vunpack.c.2.s8 %v176_v31  ;;  %v373_v57 = vunpack.c.2.s8 %v177_v41  ;;  %v705_v59 = vand.u32 255, %v369_v51 }
  0xbf   : > { %1705 = vst.msk [vmem:[%s2283_s22 + $0x408] sm:$0xff] %vm1576_vm0, %v1368_v8  ;;  %v1040_v58 = vcvt.s32.f32 %v704_v50  ;;  %v706_v60 = vand.u32 255, %v370_v52  ;;  %v707_v61 = vand.u32 255, %v371_v53  ;;  %v1380_v62 = vmul.f32 %v2276_v36, %v1037_v44 }
  0xc0   : > { %1706 = vst [vmem:[%s2283_s22 + $0x410] sm:$0xff] %v1369_v11  ;;  %v708_v63 = vand.u32 255, %v372_v56  ;;  %v709_v0 = vand.u32 255, %v373_v57  ;;  %v374_v1 = vunpack.c.3.s8 %v176_v31  ;;  %v1381_v3 = vmul.f32 %v2276_v36, %v1038_v48  ;;  %v179_v11 = vld [vmem:[%s2265_s24 + $0x138] sm:$0xff] }
  0xc1   : > { %1707 = vst.msk [vmem:[%s2283_s22 + $0x418] sm:$0xff] %vm1576_vm0, %v1370_v12  ;;  %v1041_v4 = vcvt.s32.f32 %v705_v59  ;;  %v1042_v5 = vcvt.s32.f32 %v706_v60  ;;  %v1043_v6 = vcvt.s32.f32 %v707_v61  ;;  %v1382_v7 = vmul.f32 %v2276_v36, %v1039_v55 }
  0xc2   : > { %1708 = vst [vmem:[%s2283_s22 + $0x420] sm:$0xff] %v1371_v19  ;;  %v1044_v8 = vcvt.s32.f32 %v708_v63  ;;  %v710_v9 = vand.u32 255, %v374_v1  ;;  %v375_v10 = vunpack.c.3.s8 %v177_v41  ;;  %v1383_v12 = vmul.f32 %v2276_v36, %v1040_v58 }
  0xc3   : > { %1709 = vst.msk [vmem:[%s2283_s22 + $0x428] sm:$0xff] %vm1576_vm0, %v1372_v27  ;;  %v1384_v13 = vmul.f32 %v2276_v36, %v1041_v4  ;;  %v1045_v14 = vcvt.s32.f32 %v709_v0  ;;  %v376_v15 = vunpack.c.0.s8 %v178_v2  ;;  %v1385_v16 = vmul.f32 %v2276_v36, %v1042_v5 }
  0xc4   : > { %1710 = vst [vmem:[%s2283_s22 + $0x430] sm:$0xff] %v1373_v32  ;;  %v1386_v17 = vmul.f32 %v2276_v36, %v1043_v6  ;;  %v1046_v18 = vcvt.s32.f32 %v710_v9  ;;  %v711_v19 = vand.u32 255, %v375_v10  ;;  %v377_v21 = vunpack.c.0.s8 %v179_v11 }
  0xc5   : > { %1711 = vst.msk [vmem:[%s2283_s22 + $0x438] sm:$0xff] %vm1576_vm0, %v1374_v37  ;;  %v712_v20 = vand.u32 255, %v376_v15  ;;  %v378_v22 = vunpack.c.1.s8 %v178_v2  ;;  %v379_v23 = vunpack.c.1.s8 %v179_v11  ;;  %v1387_v24 = vmul.f32 %v2276_v36, %v1044_v8  ;;  %v180_v37 = vld [vmem:[%s2265_s24 + $0x140] sm:$0xff] }
  0xc6   : > { %1712 = vst [vmem:[%s2283_s22 + $0x440] sm:$0xff] %v1375_v42  ;;  %v1047_v25 = vcvt.s32.f32 %v711_v19  ;;  %v380_v26 = vunpack.c.2.s8 %v178_v2  ;;  %v381_v27 = vunpack.c.2.s8 %v179_v11  ;;  %v713_v29 = vand.u32 255, %v377_v21 }
  0xc7   : > { %1713 = vst.msk [vmem:[%s2283_s22 + $0x448] sm:$0xff] %vm1576_vm0, %v1376_v43  ;;  %v1048_v28 = vcvt.s32.f32 %v712_v20  ;;  %v714_v30 = vand.u32 255, %v378_v22  ;;  %v715_v31 = vand.u32 255, %v379_v23  ;;  %v1388_v32 = vmul.f32 %v2276_v36, %v1045_v14 }
  0xc8   : > { %1714 = vst [vmem:[%s2283_s22 + $0x450] sm:$0xff] %v1377_v46  ;;  %v716_v33 = vand.u32 255, %v380_v26  ;;  %v717_v34 = vand.u32 255, %v381_v27  ;;  %v382_v35 = vunpack.c.3.s8 %v178_v2  ;;  %v1389_v38 = vmul.f32 %v2276_v36, %v1046_v18  ;;  %v181_v46 = vld [vmem:[%s2265_s24 + $0x148] sm:$0xff] }
  0xc9   : > { %1715 = vst.msk [vmem:[%s2283_s22 + $0x458] sm:$0xff] %vm1576_vm0, %v1378_v47  ;;  %v1049_v39 = vcvt.s32.f32 %v713_v29  ;;  %v1050_v40 = vcvt.s32.f32 %v714_v30  ;;  %v1051_v41 = vcvt.s32.f32 %v715_v31  ;;  %v1390_v42 = vmul.f32 %v2276_v36, %v1047_v25 }
  0xca   : > { %1716 = vst [vmem:[%s2283_s22 + $0x460] sm:$0xff] %v1379_v54  ;;  %v1052_v43 = vcvt.s32.f32 %v716_v33  ;;  %v718_v44 = vand.u32 255, %v382_v35  ;;  %v383_v45 = vunpack.c.3.s8 %v179_v11  ;;  %v1391_v47 = vmul.f32 %v2276_v36, %v1048_v28 }
  0xcb   : > { %1717 = vst.msk [vmem:[%s2283_s22 + $0x468] sm:$0xff] %vm1576_vm0, %v1380_v62  ;;  %v1392_v48 = vmul.f32 %v2276_v36, %v1049_v39  ;;  %v1053_v49 = vcvt.s32.f32 %v717_v34  ;;  %v384_v50 = vunpack.c.0.s8 %v180_v37  ;;  %v1393_v51 = vmul.f32 %v2276_v36, %v1050_v40 }
  0xcc   : > { %1718 = vst [vmem:[%s2283_s22 + $0x470] sm:$0xff] %v1381_v3  ;;  %v1394_v52 = vmul.f32 %v2276_v36, %v1051_v41  ;;  %v1054_v53 = vcvt.s32.f32 %v718_v44  ;;  %v719_v54 = vand.u32 255, %v383_v45  ;;  %v385_v56 = vunpack.c.0.s8 %v181_v46 }
  0xcd   : > { %1719 = vst.msk [vmem:[%s2283_s22 + $0x478] sm:$0xff] %vm1576_vm0, %v1382_v7  ;;  %v720_v55 = vand.u32 255, %v384_v50  ;;  %v386_v57 = vunpack.c.1.s8 %v180_v37  ;;  %v387_v58 = vunpack.c.1.s8 %v181_v46  ;;  %v1395_v59 = vmul.f32 %v2276_v36, %v1052_v43  ;;  %v182_v7 = vld [vmem:[%s2265_s24 + $0x150] sm:$0xff] }
  0xce   : > { %1720 = vst [vmem:[%s2283_s22 + $0x480] sm:$0xff] %v1383_v12  ;;  %v1055_v60 = vcvt.s32.f32 %v719_v54  ;;  %v388_v61 = vunpack.c.2.s8 %v180_v37  ;;  %v389_v62 = vunpack.c.2.s8 %v181_v46  ;;  %v721_v0 = vand.u32 255, %v385_v56 }
  0xcf   : > { %1721 = vst.msk [vmem:[%s2283_s22 + $0x488] sm:$0xff] %vm1576_vm0, %v1384_v13  ;;  %v1056_v63 = vcvt.s32.f32 %v720_v55  ;;  %v722_v1 = vand.u32 255, %v386_v57  ;;  %v723_v2 = vand.u32 255, %v387_v58  ;;  %v1396_v3 = vmul.f32 %v2276_v36, %v1053_v49 }
  0xd0   : > { %1722 = vst [vmem:[%s2283_s22 + $0x490] sm:$0xff] %v1385_v16  ;;  %v724_v4 = vand.u32 255, %v388_v61  ;;  %v725_v5 = vand.u32 255, %v389_v62  ;;  %v390_v6 = vunpack.c.3.s8 %v180_v37  ;;  %v1397_v8 = vmul.f32 %v2276_v36, %v1054_v53  ;;  %v183_v16 = vld [vmem:[%s2265_s24 + $0x158] sm:$0xff] }
  0xd1   : > { %1723 = vst.msk [vmem:[%s2283_s22 + $0x498] sm:$0xff] %vm1576_vm0, %v1386_v17  ;;  %v1057_v9 = vcvt.s32.f32 %v721_v0  ;;  %v1058_v10 = vcvt.s32.f32 %v722_v1  ;;  %v1059_v11 = vcvt.s32.f32 %v723_v2  ;;  %v1398_v12 = vmul.f32 %v2276_v36, %v1055_v60 }
  0xd2   : > { %1724 = vst [vmem:[%s2283_s22 + $0x4a0] sm:$0xff] %v1387_v24  ;;  %v1060_v13 = vcvt.s32.f32 %v724_v4  ;;  %v726_v14 = vand.u32 255, %v390_v6  ;;  %v391_v15 = vunpack.c.3.s8 %v181_v46  ;;  %v1399_v17 = vmul.f32 %v2276_v36, %v1056_v63 }
  0xd3   : > { %1725 = vst.msk [vmem:[%s2283_s22 + $0x4a8] sm:$0xff] %vm1576_vm0, %v1388_v32  ;;  %v1400_v18 = vmul.f32 %v2276_v36, %v1057_v9  ;;  %v1061_v19 = vcvt.s32.f32 %v725_v5  ;;  %v392_v20 = vunpack.c.0.s8 %v182_v7  ;;  %v1401_v21 = vmul.f32 %v2276_v36, %v1058_v10 }
  0xd4   : > { %1726 = vst [vmem:[%s2283_s22 + $0x4b0] sm:$0xff] %v1389_v38  ;;  %v1402_v22 = vmul.f32 %v2276_v36, %v1059_v11  ;;  %v1062_v23 = vcvt.s32.f32 %v726_v14  ;;  %v727_v24 = vand.u32 255, %v391_v15  ;;  %v393_v26 = vunpack.c.0.s8 %v183_v16 }
  0xd5   : > { %1727 = vst.msk [vmem:[%s2283_s22 + $0x4b8] sm:$0xff] %vm1576_vm0, %v1390_v42  ;;  %v728_v25 = vand.u32 255, %v392_v20  ;;  %v394_v27 = vunpack.c.1.s8 %v182_v7  ;;  %v395_v28 = vunpack.c.1.s8 %v183_v16  ;;  %v1403_v29 = vmul.f32 %v2276_v36, %v1060_v13  ;;  %v184_v42 = vld [vmem:[%s2265_s24 + $0x160] sm:$0xff] }
  0xd6   : > { %1728 = vst [vmem:[%s2283_s22 + $0x4c0] sm:$0xff] %v1391_v47  ;;  %v1063_v30 = vcvt.s32.f32 %v727_v24  ;;  %v396_v31 = vunpack.c.2.s8 %v182_v7  ;;  %v397_v32 = vunpack.c.2.s8 %v183_v16  ;;  %v729_v34 = vand.u32 255, %v393_v26 }
  0xd7   : > { %1729 = vst.msk [vmem:[%s2283_s22 + $0x4c8] sm:$0xff] %vm1576_vm0, %v1392_v48  ;;  %v1064_v33 = vcvt.s32.f32 %v728_v25  ;;  %v730_v35 = vand.u32 255, %v394_v27  ;;  %v731_v37 = vand.u32 255, %v395_v28  ;;  %v1404_v38 = vmul.f32 %v2276_v36, %v1061_v19 }
  0xd8   : > { %1730 = vst [vmem:[%s2283_s22 + $0x4d0] sm:$0xff] %v1393_v51  ;;  %v732_v39 = vand.u32 255, %v396_v31  ;;  %v733_v40 = vand.u32 255, %v397_v32  ;;  %v398_v41 = vunpack.c.3.s8 %v182_v7  ;;  %v1405_v43 = vmul.f32 %v2276_v36, %v1062_v23  ;;  %v185_v51 = vld [vmem:[%s2265_s24 + $0x168] sm:$0xff] }
  0xd9   : > { %1731 = vst.msk [vmem:[%s2283_s22 + $0x4d8] sm:$0xff] %vm1576_vm0, %v1394_v52  ;;  %v1065_v44 = vcvt.s32.f32 %v729_v34  ;;  %v1066_v45 = vcvt.s32.f32 %v730_v35  ;;  %v1067_v46 = vcvt.s32.f32 %v731_v37  ;;  %v1406_v47 = vmul.f32 %v2276_v36, %v1063_v30 }
  0xda   : > { %1732 = vst [vmem:[%s2283_s22 + $0x4e0] sm:$0xff] %v1395_v59  ;;  %v1068_v48 = vcvt.s32.f32 %v732_v39  ;;  %v734_v49 = vand.u32 255, %v398_v41  ;;  %v399_v50 = vunpack.c.3.s8 %v183_v16  ;;  %v1407_v52 = vmul.f32 %v2276_v36, %v1064_v33 }
  0xdb   : > { %1733 = vst.msk [vmem:[%s2283_s22 + $0x4e8] sm:$0xff] %vm1576_vm0, %v1396_v3  ;;  %v1408_v53 = vmul.f32 %v2276_v36, %v1065_v44  ;;  %v1069_v54 = vcvt.s32.f32 %v733_v40  ;;  %v400_v55 = vunpack.c.0.s8 %v184_v42  ;;  %v1409_v56 = vmul.f32 %v2276_v36, %v1066_v45 }
  0xdc   : > { %1734 = vst [vmem:[%s2283_s22 + $0x4f0] sm:$0xff] %v1397_v8  ;;  %v1410_v57 = vmul.f32 %v2276_v36, %v1067_v46  ;;  %v1070_v58 = vcvt.s32.f32 %v734_v49  ;;  %v735_v59 = vand.u32 255, %v399_v50  ;;  %v401_v61 = vunpack.c.0.s8 %v185_v51 }
  0xdd   : > { %1735 = vst.msk [vmem:[%s2283_s22 + $0x4f8] sm:$0xff] %vm1576_vm0, %v1398_v12  ;;  %v736_v60 = vand.u32 255, %v400_v55  ;;  %v402_v62 = vunpack.c.1.s8 %v184_v42  ;;  %v403_v63 = vunpack.c.1.s8 %v185_v51  ;;  %v1411_v0 = vmul.f32 %v2276_v36, %v1068_v48  ;;  %v186_v12 = vld [vmem:[%s2265_s24 + $0x170] sm:$0xff] }
  0xde   : > { %1736 = vst [vmem:[%s2283_s22 + $0x500] sm:$0xff] %v1399_v17  ;;  %v1071_v1 = vcvt.s32.f32 %v735_v59  ;;  %v404_v2 = vunpack.c.2.s8 %v184_v42  ;;  %v405_v3 = vunpack.c.2.s8 %v185_v51  ;;  %v737_v5 = vand.u32 255, %v401_v61 }
  0xdf   : > { %1737 = vst.msk [vmem:[%s2283_s22 + $0x508] sm:$0xff] %vm1576_vm0, %v1400_v18  ;;  %v1072_v4 = vcvt.s32.f32 %v736_v60  ;;  %v738_v6 = vand.u32 255, %v402_v62  ;;  %v739_v7 = vand.u32 255, %v403_v63  ;;  %v1412_v8 = vmul.f32 %v2276_v36, %v1069_v54 }
  0xe0   : > { %1738 = vst [vmem:[%s2283_s22 + $0x510] sm:$0xff] %v1401_v21  ;;  %v740_v9 = vand.u32 255, %v404_v2  ;;  %v741_v10 = vand.u32 255, %v405_v3  ;;  %v406_v11 = vunpack.c.3.s8 %v184_v42  ;;  %v1413_v13 = vmul.f32 %v2276_v36, %v1070_v58  ;;  %v187_v21 = vld [vmem:[%s2265_s24 + $0x178] sm:$0xff] }
  0xe1   : > { %1739 = vst.msk [vmem:[%s2283_s22 + $0x518] sm:$0xff] %vm1576_vm0, %v1402_v22  ;;  %v1073_v14 = vcvt.s32.f32 %v737_v5  ;;  %v1074_v15 = vcvt.s32.f32 %v738_v6  ;;  %v1075_v16 = vcvt.s32.f32 %v739_v7  ;;  %v1414_v17 = vmul.f32 %v2276_v36, %v1071_v1 }
  0xe2   : > { %1740 = vst [vmem:[%s2283_s22 + $0x520] sm:$0xff] %v1403_v29  ;;  %v1076_v18 = vcvt.s32.f32 %v740_v9  ;;  %v742_v19 = vand.u32 255, %v406_v11  ;;  %v407_v20 = vunpack.c.3.s8 %v185_v51  ;;  %v1415_v22 = vmul.f32 %v2276_v36, %v1072_v4 }
  0xe3   : > { %1741 = vst.msk [vmem:[%s2283_s22 + $0x528] sm:$0xff] %vm1576_vm0, %v1404_v38  ;;  %v1416_v23 = vmul.f32 %v2276_v36, %v1073_v14  ;;  %v1077_v24 = vcvt.s32.f32 %v741_v10  ;;  %v408_v25 = vunpack.c.0.s8 %v186_v12  ;;  %v1417_v26 = vmul.f32 %v2276_v36, %v1074_v15 }
  0xe4   : > { %1742 = vst [vmem:[%s2283_s22 + $0x530] sm:$0xff] %v1405_v43  ;;  %v1418_v27 = vmul.f32 %v2276_v36, %v1075_v16  ;;  %v1078_v28 = vcvt.s32.f32 %v742_v19  ;;  %v743_v29 = vand.u32 255, %v407_v20  ;;  %v409_v31 = vunpack.c.0.s8 %v187_v21 }
  0xe5   : > { %1743 = vst.msk [vmem:[%s2283_s22 + $0x538] sm:$0xff] %vm1576_vm0, %v1406_v47  ;;  %v744_v30 = vand.u32 255, %v408_v25  ;;  %v410_v32 = vunpack.c.1.s8 %v186_v12  ;;  %v411_v33 = vunpack.c.1.s8 %v187_v21  ;;  %v1419_v34 = vmul.f32 %v2276_v36, %v1076_v18  ;;  %v188_v47 = vld [vmem:[%s2265_s24 + $0x180] sm:$0xff] }
  0xe6   : > { %1744 = vst [vmem:[%s2283_s22 + $0x540] sm:$0xff] %v1407_v52  ;;  %v1079_v35 = vcvt.s32.f32 %v743_v29  ;;  %v412_v37 = vunpack.c.2.s8 %v186_v12  ;;  %v413_v38 = vunpack.c.2.s8 %v187_v21  ;;  %v745_v40 = vand.u32 255, %v409_v31 }
  0xe7   : > { %1745 = vst.msk [vmem:[%s2283_s22 + $0x548] sm:$0xff] %vm1576_vm0, %v1408_v53  ;;  %v1080_v39 = vcvt.s32.f32 %v744_v30  ;;  %v746_v41 = vand.u32 255, %v410_v32  ;;  %v747_v42 = vand.u32 255, %v411_v33  ;;  %v1420_v43 = vmul.f32 %v2276_v36, %v1077_v24 }
  0xe8   : > { %1746 = vst [vmem:[%s2283_s22 + $0x550] sm:$0xff] %v1409_v56  ;;  %v748_v44 = vand.u32 255, %v412_v37  ;;  %v749_v45 = vand.u32 255, %v413_v38  ;;  %v414_v46 = vunpack.c.3.s8 %v186_v12  ;;  %v1421_v48 = vmul.f32 %v2276_v36, %v1078_v28  ;;  %v189_v56 = vld [vmem:[%s2265_s24 + $0x188] sm:$0xff] }
  0xe9   : > { %1747 = vst.msk [vmem:[%s2283_s22 + $0x558] sm:$0xff] %vm1576_vm0, %v1410_v57  ;;  %v1081_v49 = vcvt.s32.f32 %v745_v40  ;;  %v1082_v50 = vcvt.s32.f32 %v746_v41  ;;  %v1083_v51 = vcvt.s32.f32 %v747_v42  ;;  %v1422_v52 = vmul.f32 %v2276_v36, %v1079_v35 }
  0xea   : > { %1748 = vst [vmem:[%s2283_s22 + $0x560] sm:$0xff] %v1411_v0  ;;  %v1084_v53 = vcvt.s32.f32 %v748_v44  ;;  %v750_v54 = vand.u32 255, %v414_v46  ;;  %v415_v55 = vunpack.c.3.s8 %v187_v21  ;;  %v1423_v57 = vmul.f32 %v2276_v36, %v1080_v39 }
  0xeb   : > { %1749 = vst.msk [vmem:[%s2283_s22 + $0x568] sm:$0xff] %vm1576_vm0, %v1412_v8  ;;  %v1424_v58 = vmul.f32 %v2276_v36, %v1081_v49  ;;  %v1085_v59 = vcvt.s32.f32 %v749_v45  ;;  %v416_v60 = vunpack.c.0.s8 %v188_v47  ;;  %v1425_v61 = vmul.f32 %v2276_v36, %v1082_v50 }
  0xec   : > { %1750 = vst [vmem:[%s2283_s22 + $0x570] sm:$0xff] %v1413_v13  ;;  %v1426_v62 = vmul.f32 %v2276_v36, %v1083_v51  ;;  %v1086_v63 = vcvt.s32.f32 %v750_v54  ;;  %v751_v0 = vand.u32 255, %v415_v55  ;;  %v417_v2 = vunpack.c.0.s8 %v189_v56 }
  0xed   : > { %1751 = vst.msk [vmem:[%s2283_s22 + $0x578] sm:$0xff] %vm1576_vm0, %v1414_v17  ;;  %v752_v1 = vand.u32 255, %v416_v60  ;;  %v418_v3 = vunpack.c.1.s8 %v188_v47  ;;  %v419_v4 = vunpack.c.1.s8 %v189_v56  ;;  %v1427_v5 = vmul.f32 %v2276_v36, %v1084_v53  ;;  %v190_v17 = vld [vmem:[%s2265_s24 + $0x190] sm:$0xff] }
  0xee   : > { %1752 = vst [vmem:[%s2283_s22 + $0x580] sm:$0xff] %v1415_v22  ;;  %v1087_v6 = vcvt.s32.f32 %v751_v0  ;;  %v420_v7 = vunpack.c.2.s8 %v188_v47  ;;  %v421_v8 = vunpack.c.2.s8 %v189_v56  ;;  %v753_v10 = vand.u32 255, %v417_v2 }
  0xef   : > { %1753 = vst.msk [vmem:[%s2283_s22 + $0x588] sm:$0xff] %vm1576_vm0, %v1416_v23  ;;  %v1088_v9 = vcvt.s32.f32 %v752_v1  ;;  %v754_v11 = vand.u32 255, %v418_v3  ;;  %v755_v12 = vand.u32 255, %v419_v4  ;;  %v1428_v13 = vmul.f32 %v2276_v36, %v1085_v59 }
  0xf0   : > { %1754 = vst [vmem:[%s2283_s22 + $0x590] sm:$0xff] %v1417_v26  ;;  %v756_v14 = vand.u32 255, %v420_v7  ;;  %v757_v15 = vand.u32 255, %v421_v8  ;;  %v422_v16 = vunpack.c.3.s8 %v188_v47  ;;  %v1429_v18 = vmul.f32 %v2276_v36, %v1086_v63  ;;  %v191_v26 = vld [vmem:[%s2265_s24 + $0x198] sm:$0xff] }
  0xf1   : > { %1755 = vst.msk [vmem:[%s2283_s22 + $0x598] sm:$0xff] %vm1576_vm0, %v1418_v27  ;;  %v1089_v19 = vcvt.s32.f32 %v753_v10  ;;  %v1090_v20 = vcvt.s32.f32 %v754_v11  ;;  %v1091_v21 = vcvt.s32.f32 %v755_v12  ;;  %v1430_v22 = vmul.f32 %v2276_v36, %v1087_v6 }
  0xf2   : > { %1756 = vst [vmem:[%s2283_s22 + $0x5a0] sm:$0xff] %v1419_v34  ;;  %v1092_v23 = vcvt.s32.f32 %v756_v14  ;;  %v758_v24 = vand.u32 255, %v422_v16  ;;  %v423_v25 = vunpack.c.3.s8 %v189_v56  ;;  %v1431_v27 = vmul.f32 %v2276_v36, %v1088_v9 }
  0xf3   : > { %1757 = vst.msk [vmem:[%s2283_s22 + $0x5a8] sm:$0xff] %vm1576_vm0, %v1420_v43  ;;  %v1432_v28 = vmul.f32 %v2276_v36, %v1089_v19  ;;  %v1093_v29 = vcvt.s32.f32 %v757_v15  ;;  %v424_v30 = vunpack.c.0.s8 %v190_v17  ;;  %v1433_v31 = vmul.f32 %v2276_v36, %v1090_v20 }
  0xf4   : > { %1758 = vst [vmem:[%s2283_s22 + $0x5b0] sm:$0xff] %v1421_v48  ;;  %v1434_v32 = vmul.f32 %v2276_v36, %v1091_v21  ;;  %v1094_v33 = vcvt.s32.f32 %v758_v24  ;;  %v759_v34 = vand.u32 255, %v423_v25  ;;  %v425_v37 = vunpack.c.0.s8 %v191_v26 }
  0xf5   : > { %1759 = vst.msk [vmem:[%s2283_s22 + $0x5b8] sm:$0xff] %vm1576_vm0, %v1422_v52  ;;  %v760_v35 = vand.u32 255, %v424_v30  ;;  %v426_v38 = vunpack.c.1.s8 %v190_v17  ;;  %v427_v39 = vunpack.c.1.s8 %v191_v26  ;;  %v1435_v40 = vmul.f32 %v2276_v36, %v1092_v23  ;;  %v192_v52 = vld [vmem:[%s2265_s24 + $0x1a0] sm:$0xff] }
  0xf6   : > { %1760 = vst [vmem:[%s2283_s22 + $0x5c0] sm:$0xff] %v1423_v57  ;;  %v1095_v41 = vcvt.s32.f32 %v759_v34  ;;  %v428_v42 = vunpack.c.2.s8 %v190_v17  ;;  %v429_v43 = vunpack.c.2.s8 %v191_v26  ;;  %v761_v45 = vand.u32 255, %v425_v37 }
  0xf7   : > { %1761 = vst.msk [vmem:[%s2283_s22 + $0x5c8] sm:$0xff] %vm1576_vm0, %v1424_v58  ;;  %v1096_v44 = vcvt.s32.f32 %v760_v35  ;;  %v762_v46 = vand.u32 255, %v426_v38  ;;  %v763_v47 = vand.u32 255, %v427_v39  ;;  %v1436_v48 = vmul.f32 %v2276_v36, %v1093_v29 }
  0xf8   : > { %1762 = vst [vmem:[%s2283_s22 + $0x5d0] sm:$0xff] %v1425_v61  ;;  %v764_v49 = vand.u32 255, %v428_v42  ;;  %v765_v50 = vand.u32 255, %v429_v43  ;;  %v430_v51 = vunpack.c.3.s8 %v190_v17  ;;  %v1437_v53 = vmul.f32 %v2276_v36, %v1094_v33  ;;  %v193_v61 = vld [vmem:[%s2265_s24 + $0x1a8] sm:$0xff] }
  0xf9   : > { %1763 = vst.msk [vmem:[%s2283_s22 + $0x5d8] sm:$0xff] %vm1576_vm0, %v1426_v62  ;;  %v1097_v54 = vcvt.s32.f32 %v761_v45  ;;  %v1098_v55 = vcvt.s32.f32 %v762_v46  ;;  %v1099_v56 = vcvt.s32.f32 %v763_v47  ;;  %v1438_v57 = vmul.f32 %v2276_v36, %v1095_v41 }
  0xfa   : > { %1764 = vst [vmem:[%s2283_s22 + $0x5e0] sm:$0xff] %v1427_v5  ;;  %v1100_v58 = vcvt.s32.f32 %v764_v49  ;;  %v766_v59 = vand.u32 255, %v430_v51  ;;  %v431_v60 = vunpack.c.3.s8 %v191_v26  ;;  %v1439_v62 = vmul.f32 %v2276_v36, %v1096_v44 }
  0xfb   : > { %1765 = vst.msk [vmem:[%s2283_s22 + $0x5e8] sm:$0xff] %vm1576_vm0, %v1428_v13  ;;  %v1440_v63 = vmul.f32 %v2276_v36, %v1097_v54  ;;  %v1101_v0 = vcvt.s32.f32 %v765_v50  ;;  %v432_v1 = vunpack.c.0.s8 %v192_v52  ;;  %v1441_v2 = vmul.f32 %v2276_v36, %v1098_v55 }
  0xfc   : > { %1766 = vst [vmem:[%s2283_s22 + $0x5f0] sm:$0xff] %v1429_v18  ;;  %v1442_v3 = vmul.f32 %v2276_v36, %v1099_v56  ;;  %v1102_v4 = vcvt.s32.f32 %v766_v59  ;;  %v767_v5 = vand.u32 255, %v431_v60  ;;  %v433_v7 = vunpack.c.0.s8 %v193_v61 }
  0xfd   : > { %1767 = vst.msk [vmem:[%s2283_s22 + $0x5f8] sm:$0xff] %vm1576_vm0, %v1430_v22  ;;  %v768_v6 = vand.u32 255, %v432_v1  ;;  %v434_v8 = vunpack.c.1.s8 %v192_v52  ;;  %v435_v9 = vunpack.c.1.s8 %v193_v61  ;;  %v1443_v10 = vmul.f32 %v2276_v36, %v1100_v58  ;;  %v194_v22 = vld [vmem:[%s2265_s24 + $0x1b0] sm:$0xff] }
  0xfe   : > { %1768 = vst [vmem:[%s2283_s22 + $0x600] sm:$0xff] %v1431_v27  ;;  %v1103_v11 = vcvt.s32.f32 %v767_v5  ;;  %v436_v12 = vunpack.c.2.s8 %v192_v52  ;;  %v437_v13 = vunpack.c.2.s8 %v193_v61  ;;  %v769_v15 = vand.u32 255, %v433_v7 }
  0xff   : > { %1769 = vst.msk [vmem:[%s2283_s22 + $0x608] sm:$0xff] %vm1576_vm0, %v1432_v28  ;;  %v1104_v14 = vcvt.s32.f32 %v768_v6  ;;  %v770_v16 = vand.u32 255, %v434_v8  ;;  %v771_v17 = vand.u32 255, %v435_v9  ;;  %v1444_v18 = vmul.f32 %v2276_v36, %v1101_v0 }
 0x100   : > { %1770 = vst [vmem:[%s2283_s22 + $0x610] sm:$0xff] %v1433_v31  ;;  %v772_v19 = vand.u32 255, %v436_v12  ;;  %v773_v20 = vand.u32 255, %v437_v13  ;;  %v438_v21 = vunpack.c.3.s8 %v192_v52  ;;  %v1445_v23 = vmul.f32 %v2276_v36, %v1102_v4  ;;  %v195_v31 = vld [vmem:[%s2265_s24 + $0x1b8] sm:$0xff] }
 0x101   : > { %1771 = vst.msk [vmem:[%s2283_s22 + $0x618] sm:$0xff] %vm1576_vm0, %v1434_v32  ;;  %v1105_v24 = vcvt.s32.f32 %v769_v15  ;;  %v1106_v25 = vcvt.s32.f32 %v770_v16  ;;  %v1107_v26 = vcvt.s32.f32 %v771_v17  ;;  %v1446_v27 = vmul.f32 %v2276_v36, %v1103_v11 }
 0x102   : > { %1772 = vst [vmem:[%s2283_s22 + $0x620] sm:$0xff] %v1435_v40  ;;  %v1108_v28 = vcvt.s32.f32 %v772_v19  ;;  %v774_v29 = vand.u32 255, %v438_v21  ;;  %v439_v30 = vunpack.c.3.s8 %v193_v61  ;;  %v1447_v32 = vmul.f32 %v2276_v36, %v1104_v14 }
 0x103   : > { %1773 = vst.msk [vmem:[%s2283_s22 + $0x628] sm:$0xff] %vm1576_vm0, %v1436_v48  ;;  %v1448_v33 = vmul.f32 %v2276_v36, %v1105_v24  ;;  %v1109_v34 = vcvt.s32.f32 %v773_v20  ;;  %v440_v35 = vunpack.c.0.s8 %v194_v22  ;;  %v1449_v37 = vmul.f32 %v2276_v36, %v1106_v25 }
 0x104   : > { %1774 = vst [vmem:[%s2283_s22 + $0x630] sm:$0xff] %v1437_v53  ;;  %v1450_v38 = vmul.f32 %v2276_v36, %v1107_v26  ;;  %v1110_v39 = vcvt.s32.f32 %v774_v29  ;;  %v775_v40 = vand.u32 255, %v439_v30  ;;  %v441_v42 = vunpack.c.0.s8 %v195_v31 }
 0x105   : > { %1775 = vst.msk [vmem:[%s2283_s22 + $0x638] sm:$0xff] %vm1576_vm0, %v1438_v57  ;;  %v776_v41 = vand.u32 255, %v440_v35  ;;  %v442_v43 = vunpack.c.1.s8 %v194_v22  ;;  %v443_v44 = vunpack.c.1.s8 %v195_v31  ;;  %v1451_v45 = vmul.f32 %v2276_v36, %v1108_v28  ;;  %v196_v57 = vld [vmem:[%s2265_s24 + $0x1c0] sm:$0xff] }
 0x106   : > { %1776 = vst [vmem:[%s2283_s22 + $0x640] sm:$0xff] %v1439_v62  ;;  %v1111_v46 = vcvt.s32.f32 %v775_v40  ;;  %v444_v47 = vunpack.c.2.s8 %v194_v22  ;;  %v445_v48 = vunpack.c.2.s8 %v195_v31  ;;  %v777_v50 = vand.u32 255, %v441_v42 }
 0x107   : > { %1777 = vst.msk [vmem:[%s2283_s22 + $0x648] sm:$0xff] %vm1576_vm0, %v1440_v63  ;;  %v1112_v49 = vcvt.s32.f32 %v776_v41  ;;  %v778_v51 = vand.u32 255, %v442_v43  ;;  %v779_v52 = vand.u32 255, %v443_v44  ;;  %v1452_v53 = vmul.f32 %v2276_v36, %v1109_v34 }
 0x108   : > { %1778 = vst [vmem:[%s2283_s22 + $0x650] sm:$0xff] %v1441_v2  ;;  %v780_v54 = vand.u32 255, %v444_v47  ;;  %v781_v55 = vand.u32 255, %v445_v48  ;;  %v446_v56 = vunpack.c.3.s8 %v194_v22  ;;  %v1453_v58 = vmul.f32 %v2276_v36, %v1110_v39  ;;  %v197_v2 = vld [vmem:[%s2265_s24 + $0x1c8] sm:$0xff] }
 0x109   : > { %1779 = vst.msk [vmem:[%s2283_s22 + $0x658] sm:$0xff] %vm1576_vm0, %v1442_v3  ;;  %v1113_v59 = vcvt.s32.f32 %v777_v50  ;;  %v1114_v60 = vcvt.s32.f32 %v778_v51  ;;  %v1115_v61 = vcvt.s32.f32 %v779_v52  ;;  %v1454_v62 = vmul.f32 %v2276_v36, %v1111_v46 }
 0x10a   : > { %1780 = vst [vmem:[%s2283_s22 + $0x660] sm:$0xff] %v1443_v10  ;;  %v1116_v63 = vcvt.s32.f32 %v780_v54  ;;  %v782_v0 = vand.u32 255, %v446_v56  ;;  %v447_v1 = vunpack.c.3.s8 %v195_v31  ;;  %v1455_v3 = vmul.f32 %v2276_v36, %v1112_v49 }
 0x10b   : > { %1781 = vst.msk [vmem:[%s2283_s22 + $0x668] sm:$0xff] %vm1576_vm0, %v1444_v18  ;;  %v1456_v4 = vmul.f32 %v2276_v36, %v1113_v59  ;;  %v1117_v5 = vcvt.s32.f32 %v781_v55  ;;  %v448_v6 = vunpack.c.0.s8 %v196_v57  ;;  %v1457_v7 = vmul.f32 %v2276_v36, %v1114_v60 }
 0x10c   : > { %1782 = vst [vmem:[%s2283_s22 + $0x670] sm:$0xff] %v1445_v23  ;;  %v1458_v8 = vmul.f32 %v2276_v36, %v1115_v61  ;;  %v1118_v9 = vcvt.s32.f32 %v782_v0  ;;  %v783_v10 = vand.u32 255, %v447_v1  ;;  %v449_v12 = vunpack.c.0.s8 %v197_v2 }
 0x10d   : > { %1783 = vst.msk [vmem:[%s2283_s22 + $0x678] sm:$0xff] %vm1576_vm0, %v1446_v27  ;;  %v784_v11 = vand.u32 255, %v448_v6  ;;  %v450_v13 = vunpack.c.1.s8 %v196_v57  ;;  %v451_v14 = vunpack.c.1.s8 %v197_v2  ;;  %v1459_v15 = vmul.f32 %v2276_v36, %v1116_v63  ;;  %v198_v27 = vld [vmem:[%s2265_s24 + $0x1d0] sm:$0xff] }
 0x10e   : > { %1784 = vst [vmem:[%s2283_s22 + $0x680] sm:$0xff] %v1447_v32  ;;  %v1119_v16 = vcvt.s32.f32 %v783_v10  ;;  %v452_v17 = vunpack.c.2.s8 %v196_v57  ;;  %v453_v18 = vunpack.c.2.s8 %v197_v2  ;;  %v785_v20 = vand.u32 255, %v449_v12 }
 0x10f   : > { %1785 = vst.msk [vmem:[%s2283_s22 + $0x688] sm:$0xff] %vm1576_vm0, %v1448_v33  ;;  %v1120_v19 = vcvt.s32.f32 %v784_v11  ;;  %v786_v21 = vand.u32 255, %v450_v13  ;;  %v787_v22 = vand.u32 255, %v451_v14  ;;  %v1460_v23 = vmul.f32 %v2276_v36, %v1117_v5 }
 0x110   : > { %1786 = vst [vmem:[%s2283_s22 + $0x690] sm:$0xff] %v1449_v37  ;;  %v788_v24 = vand.u32 255, %v452_v17  ;;  %v789_v25 = vand.u32 255, %v453_v18  ;;  %v454_v26 = vunpack.c.3.s8 %v196_v57  ;;  %v1461_v28 = vmul.f32 %v2276_v36, %v1118_v9  ;;  %v199_v37 = vld [vmem:[%s2265_s24 + $0x1d8] sm:$0xff] }
 0x111   : > { %1787 = vst.msk [vmem:[%s2283_s22 + $0x698] sm:$0xff] %vm1576_vm0, %v1450_v38  ;;  %v1121_v29 = vcvt.s32.f32 %v785_v20  ;;  %v1122_v30 = vcvt.s32.f32 %v786_v21  ;;  %v1123_v31 = vcvt.s32.f32 %v787_v22  ;;  %v1462_v32 = vmul.f32 %v2276_v36, %v1119_v16 }
 0x112   : > { %1788 = vst [vmem:[%s2283_s22 + $0x6a0] sm:$0xff] %v1451_v45  ;;  %v1124_v33 = vcvt.s32.f32 %v788_v24  ;;  %v790_v34 = vand.u32 255, %v454_v26  ;;  %v455_v35 = vunpack.c.3.s8 %v197_v2  ;;  %v1463_v38 = vmul.f32 %v2276_v36, %v1120_v19 }
 0x113   : > { %1789 = vst.msk [vmem:[%s2283_s22 + $0x6a8] sm:$0xff] %vm1576_vm0, %v1452_v53  ;;  %v1464_v39 = vmul.f32 %v2276_v36, %v1121_v29  ;;  %v1125_v40 = vcvt.s32.f32 %v789_v25  ;;  %v456_v41 = vunpack.c.0.s8 %v198_v27  ;;  %v1465_v42 = vmul.f32 %v2276_v36, %v1122_v30 }
 0x114   : > { %1790 = vst [vmem:[%s2283_s22 + $0x6b0] sm:$0xff] %v1453_v58  ;;  %v1466_v43 = vmul.f32 %v2276_v36, %v1123_v31  ;;  %v1126_v44 = vcvt.s32.f32 %v790_v34  ;;  %v791_v45 = vand.u32 255, %v455_v35  ;;  %v457_v47 = vunpack.c.0.s8 %v199_v37 }
 0x115   : > { %1791 = vst.msk [vmem:[%s2283_s22 + $0x6b8] sm:$0xff] %vm1576_vm0, %v1454_v62  ;;  %v792_v46 = vand.u32 255, %v456_v41  ;;  %v458_v48 = vunpack.c.1.s8 %v198_v27  ;;  %v459_v49 = vunpack.c.1.s8 %v199_v37  ;;  %v1467_v50 = vmul.f32 %v2276_v36, %v1124_v33  ;;  %v200_v62 = vld [vmem:[%s2265_s24 + $0x1e0] sm:$0xff] }
 0x116   : > { %1792 = vst [vmem:[%s2283_s22 + $0x6c0] sm:$0xff] %v1455_v3  ;;  %v1127_v51 = vcvt.s32.f32 %v791_v45  ;;  %v460_v52 = vunpack.c.2.s8 %v198_v27  ;;  %v461_v53 = vunpack.c.2.s8 %v199_v37  ;;  %v793_v55 = vand.u32 255, %v457_v47 }
 0x117   : > { %1793 = vst.msk [vmem:[%s2283_s22 + $0x6c8] sm:$0xff] %vm1576_vm0, %v1456_v4  ;;  %v1128_v54 = vcvt.s32.f32 %v792_v46  ;;  %v794_v56 = vand.u32 255, %v458_v48  ;;  %v795_v57 = vand.u32 255, %v459_v49  ;;  %v1468_v58 = vmul.f32 %v2276_v36, %v1125_v40 }
 0x118   : > { %1794 = vst [vmem:[%s2283_s22 + $0x6d0] sm:$0xff] %v1457_v7  ;;  %v796_v59 = vand.u32 255, %v460_v52  ;;  %v797_v60 = vand.u32 255, %v461_v53  ;;  %v462_v61 = vunpack.c.3.s8 %v198_v27  ;;  %v1469_v63 = vmul.f32 %v2276_v36, %v1126_v44  ;;  %v201_v7 = vld [vmem:[%s2265_s24 + $0x1e8] sm:$0xff] }
 0x119   : > { %1795 = vst.msk [vmem:[%s2283_s22 + $0x6d8] sm:$0xff] %vm1576_vm0, %v1458_v8  ;;  %v1129_v0 = vcvt.s32.f32 %v793_v55  ;;  %v1130_v1 = vcvt.s32.f32 %v794_v56  ;;  %v1131_v2 = vcvt.s32.f32 %v795_v57  ;;  %v1470_v3 = vmul.f32 %v2276_v36, %v1127_v51 }
 0x11a   : > { %1796 = vst [vmem:[%s2283_s22 + $0x6e0] sm:$0xff] %v1459_v15  ;;  %v1132_v4 = vcvt.s32.f32 %v796_v59  ;;  %v798_v5 = vand.u32 255, %v462_v61  ;;  %v463_v6 = vunpack.c.3.s8 %v199_v37  ;;  %v1471_v8 = vmul.f32 %v2276_v36, %v1128_v54 }
 0x11b   : > { %1797 = vst.msk [vmem:[%s2283_s22 + $0x6e8] sm:$0xff] %vm1576_vm0, %v1460_v23  ;;  %v1472_v9 = vmul.f32 %v2276_v36, %v1129_v0  ;;  %v1133_v10 = vcvt.s32.f32 %v797_v60  ;;  %v464_v11 = vunpack.c.0.s8 %v200_v62  ;;  %v1473_v12 = vmul.f32 %v2276_v36, %v1130_v1 }
 0x11c   : > { %1798 = vst [vmem:[%s2283_s22 + $0x6f0] sm:$0xff] %v1461_v28  ;;  %v1474_v13 = vmul.f32 %v2276_v36, %v1131_v2  ;;  %v1134_v14 = vcvt.s32.f32 %v798_v5  ;;  %v799_v15 = vand.u32 255, %v463_v6  ;;  %v465_v17 = vunpack.c.0.s8 %v201_v7 }
 0x11d   : > { %1799 = vst.msk [vmem:[%s2283_s22 + $0x6f8] sm:$0xff] %vm1576_vm0, %v1462_v32  ;;  %v800_v16 = vand.u32 255, %v464_v11  ;;  %v466_v18 = vunpack.c.1.s8 %v200_v62  ;;  %v467_v19 = vunpack.c.1.s8 %v201_v7  ;;  %v1475_v20 = vmul.f32 %v2276_v36, %v1132_v4  ;;  %v202_v32 = vld [vmem:[%s2265_s24 + $0x1f0] sm:$0xff] }
 0x11e   : > { %1800 = vst [vmem:[%s2283_s22 + $0x700] sm:$0xff] %v1463_v38  ;;  %v1135_v21 = vcvt.s32.f32 %v799_v15  ;;  %v468_v22 = vunpack.c.2.s8 %v200_v62  ;;  %v469_v23 = vunpack.c.2.s8 %v201_v7  ;;  %v801_v25 = vand.u32 255, %v465_v17 }
 0x11f   : > { %1801 = vst.msk [vmem:[%s2283_s22 + $0x708] sm:$0xff] %vm1576_vm0, %v1464_v39  ;;  %v1136_v24 = vcvt.s32.f32 %v800_v16  ;;  %v802_v26 = vand.u32 255, %v466_v18  ;;  %v803_v27 = vand.u32 255, %v467_v19  ;;  %v1476_v28 = vmul.f32 %v2276_v36, %v1133_v10 }
 0x120   : > { %1802 = vst [vmem:[%s2283_s22 + $0x710] sm:$0xff] %v1465_v42  ;;  %v804_v29 = vand.u32 255, %v468_v22  ;;  %v805_v30 = vand.u32 255, %v469_v23  ;;  %v470_v31 = vunpack.c.3.s8 %v200_v62  ;;  %v1477_v33 = vmul.f32 %v2276_v36, %v1134_v14  ;;  %v203_v42 = vld [vmem:[%s2265_s24 + $0x1f8] sm:$0xff] }
 0x121   : > { %1803 = vst.msk [vmem:[%s2283_s22 + $0x718] sm:$0xff] %vm1576_vm0, %v1466_v43  ;;  %v1137_v34 = vcvt.s32.f32 %v801_v25  ;;  %v1138_v35 = vcvt.s32.f32 %v802_v26  ;;  %v1139_v37 = vcvt.s32.f32 %v803_v27  ;;  %v1478_v38 = vmul.f32 %v2276_v36, %v1135_v21 }
 0x122   : > { %1804 = vst [vmem:[%s2283_s22 + $0x720] sm:$0xff] %v1467_v50  ;;  %v1140_v39 = vcvt.s32.f32 %v804_v29  ;;  %v806_v40 = vand.u32 255, %v470_v31  ;;  %v471_v41 = vunpack.c.3.s8 %v201_v7  ;;  %v1479_v43 = vmul.f32 %v2276_v36, %v1136_v24 }
 0x123   : > { %1805 = vst.msk [vmem:[%s2283_s22 + $0x728] sm:$0xff] %vm1576_vm0, %v1468_v58  ;;  %v1480_v44 = vmul.f32 %v2276_v36, %v1137_v34  ;;  %v1141_v45 = vcvt.s32.f32 %v805_v30  ;;  %v472_v46 = vunpack.c.0.s8 %v202_v32  ;;  %v1481_v47 = vmul.f32 %v2276_v36, %v1138_v35 }
 0x124   : > { %1806 = vst [vmem:[%s2283_s22 + $0x730] sm:$0xff] %v1469_v63  ;;  %v1482_v48 = vmul.f32 %v2276_v36, %v1139_v37  ;;  %v1142_v49 = vcvt.s32.f32 %v806_v40  ;;  %v807_v50 = vand.u32 255, %v471_v41  ;;  %v473_v52 = vunpack.c.0.s8 %v203_v42 }
 0x125   : > { %1807 = vst.msk [vmem:[%s2283_s22 + $0x738] sm:$0xff] %vm1576_vm0, %v1470_v3  ;;  %v808_v51 = vand.u32 255, %v472_v46  ;;  %v474_v53 = vunpack.c.1.s8 %v202_v32  ;;  %v475_v54 = vunpack.c.1.s8 %v203_v42  ;;  %v1483_v55 = vmul.f32 %v2276_v36, %v1140_v39  ;;  %v204_v3 = vld [vmem:[%s2265_s24 + $0x200] sm:$0xff] }
 0x126   : > { %1808 = vst [vmem:[%s2283_s22 + $0x740] sm:$0xff] %v1471_v8  ;;  %v1143_v56 = vcvt.s32.f32 %v807_v50  ;;  %v476_v57 = vunpack.c.2.s8 %v202_v32  ;;  %v477_v58 = vunpack.c.2.s8 %v203_v42  ;;  %v809_v60 = vand.u32 255, %v473_v52 }
 0x127   : > { %1809 = vst.msk [vmem:[%s2283_s22 + $0x748] sm:$0xff] %vm1576_vm0, %v1472_v9  ;;  %v1144_v59 = vcvt.s32.f32 %v808_v51  ;;  %v810_v61 = vand.u32 255, %v474_v53  ;;  %v811_v62 = vand.u32 255, %v475_v54  ;;  %v1484_v63 = vmul.f32 %v2276_v36, %v1141_v45 }
 0x128   : > { %1810 = vst [vmem:[%s2283_s22 + $0x750] sm:$0xff] %v1473_v12  ;;  %v812_v0 = vand.u32 255, %v476_v57  ;;  %v813_v1 = vand.u32 255, %v477_v58  ;;  %v478_v2 = vunpack.c.3.s8 %v202_v32  ;;  %v1485_v4 = vmul.f32 %v2276_v36, %v1142_v49  ;;  %v205_v12 = vld [vmem:[%s2265_s24 + $0x208] sm:$0xff] }
 0x129   : > { %1811 = vst.msk [vmem:[%s2283_s22 + $0x758] sm:$0xff] %vm1576_vm0, %v1474_v13  ;;  %v1145_v5 = vcvt.s32.f32 %v809_v60  ;;  %v1146_v6 = vcvt.s32.f32 %v810_v61  ;;  %v1147_v7 = vcvt.s32.f32 %v811_v62  ;;  %v1486_v8 = vmul.f32 %v2276_v36, %v1143_v56 }
 0x12a   : > { %1812 = vst [vmem:[%s2283_s22 + $0x760] sm:$0xff] %v1475_v20  ;;  %v1148_v9 = vcvt.s32.f32 %v812_v0  ;;  %v814_v10 = vand.u32 255, %v478_v2  ;;  %v479_v11 = vunpack.c.3.s8 %v203_v42  ;;  %v1487_v13 = vmul.f32 %v2276_v36, %v1144_v59 }
 0x12b   : > { %1813 = vst.msk [vmem:[%s2283_s22 + $0x768] sm:$0xff] %vm1576_vm0, %v1476_v28  ;;  %v1488_v14 = vmul.f32 %v2276_v36, %v1145_v5  ;;  %v1149_v15 = vcvt.s32.f32 %v813_v1  ;;  %v480_v16 = vunpack.c.0.s8 %v204_v3  ;;  %v1489_v17 = vmul.f32 %v2276_v36, %v1146_v6 }
 0x12c   : > { %1814 = vst [vmem:[%s2283_s22 + $0x770] sm:$0xff] %v1477_v33  ;;  %v1490_v18 = vmul.f32 %v2276_v36, %v1147_v7  ;;  %v1150_v19 = vcvt.s32.f32 %v814_v10  ;;  %v815_v20 = vand.u32 255, %v479_v11  ;;  %v481_v22 = vunpack.c.0.s8 %v205_v12 }
 0x12d   : > { %1815 = vst.msk [vmem:[%s2283_s22 + $0x778] sm:$0xff] %vm1576_vm0, %v1478_v38  ;;  %v816_v21 = vand.u32 255, %v480_v16  ;;  %v482_v23 = vunpack.c.1.s8 %v204_v3  ;;  %v483_v24 = vunpack.c.1.s8 %v205_v12  ;;  %v1491_v25 = vmul.f32 %v2276_v36, %v1148_v9  ;;  %v206_v38 = vld [vmem:[%s2265_s24 + $0x210] sm:$0xff] }
 0x12e   : > { %1816 = vst [vmem:[%s2283_s22 + $0x780] sm:$0xff] %v1479_v43  ;;  %v1151_v26 = vcvt.s32.f32 %v815_v20  ;;  %v484_v27 = vunpack.c.2.s8 %v204_v3  ;;  %v485_v28 = vunpack.c.2.s8 %v205_v12  ;;  %v817_v30 = vand.u32 255, %v481_v22 }
 0x12f   : > { %1817 = vst.msk [vmem:[%s2283_s22 + $0x788] sm:$0xff] %vm1576_vm0, %v1480_v44  ;;  %v1152_v29 = vcvt.s32.f32 %v816_v21  ;;  %v818_v31 = vand.u32 255, %v482_v23  ;;  %v819_v32 = vand.u32 255, %v483_v24  ;;  %v1492_v33 = vmul.f32 %v2276_v36, %v1149_v15 }
 0x130   : > { %1818 = vst [vmem:[%s2283_s22 + $0x790] sm:$0xff] %v1481_v47  ;;  %v820_v34 = vand.u32 255, %v484_v27  ;;  %v821_v35 = vand.u32 255, %v485_v28  ;;  %v486_v37 = vunpack.c.3.s8 %v204_v3  ;;  %v1493_v39 = vmul.f32 %v2276_v36, %v1150_v19  ;;  %v207_v47 = vld [vmem:[%s2265_s24 + $0x218] sm:$0xff] }
 0x131   : > { %1819 = vst.msk [vmem:[%s2283_s22 + $0x798] sm:$0xff] %vm1576_vm0, %v1482_v48  ;;  %v1153_v40 = vcvt.s32.f32 %v817_v30  ;;  %v1154_v41 = vcvt.s32.f32 %v818_v31  ;;  %v1155_v42 = vcvt.s32.f32 %v819_v32  ;;  %v1494_v43 = vmul.f32 %v2276_v36, %v1151_v26 }
 0x132   : > { %1820 = vst [vmem:[%s2283_s22 + $0x7a0] sm:$0xff] %v1483_v55  ;;  %v1156_v44 = vcvt.s32.f32 %v820_v34  ;;  %v822_v45 = vand.u32 255, %v486_v37  ;;  %v487_v46 = vunpack.c.3.s8 %v205_v12  ;;  %v1495_v48 = vmul.f32 %v2276_v36, %v1152_v29 }
 0x133   : > { %1821 = vst.msk [vmem:[%s2283_s22 + $0x7a8] sm:$0xff] %vm1576_vm0, %v1484_v63  ;;  %v1496_v49 = vmul.f32 %v2276_v36, %v1153_v40  ;;  %v1157_v50 = vcvt.s32.f32 %v821_v35  ;;  %v488_v51 = vunpack.c.0.s8 %v206_v38  ;;  %v1497_v52 = vmul.f32 %v2276_v36, %v1154_v41 }
 0x134   : > { %1822 = vst [vmem:[%s2283_s22 + $0x7b0] sm:$0xff] %v1485_v4  ;;  %v1498_v53 = vmul.f32 %v2276_v36, %v1155_v42  ;;  %v1158_v54 = vcvt.s32.f32 %v822_v45  ;;  %v823_v55 = vand.u32 255, %v487_v46  ;;  %v489_v57 = vunpack.c.0.s8 %v207_v47 }
 0x135   : > { %1823 = vst.msk [vmem:[%s2283_s22 + $0x7b8] sm:$0xff] %vm1576_vm0, %v1486_v8  ;;  %v824_v56 = vand.u32 255, %v488_v51  ;;  %v490_v58 = vunpack.c.1.s8 %v206_v38  ;;  %v491_v59 = vunpack.c.1.s8 %v207_v47  ;;  %v1499_v60 = vmul.f32 %v2276_v36, %v1156_v44  ;;  %v208_v8 = vld [vmem:[%s2265_s24 + $0x220] sm:$0xff] }
 0x136   : > { %1824 = vst [vmem:[%s2283_s22 + $0x7c0] sm:$0xff] %v1487_v13  ;;  %v1159_v61 = vcvt.s32.f32 %v823_v55  ;;  %v492_v62 = vunpack.c.2.s8 %v206_v38  ;;  %v493_v63 = vunpack.c.2.s8 %v207_v47  ;;  %v825_v1 = vand.u32 255, %v489_v57 }
 0x137   : > { %1825 = vst.msk [vmem:[%s2283_s22 + $0x7c8] sm:$0xff] %vm1576_vm0, %v1488_v14  ;;  %v1160_v0 = vcvt.s32.f32 %v824_v56  ;;  %v826_v2 = vand.u32 255, %v490_v58  ;;  %v827_v3 = vand.u32 255, %v491_v59  ;;  %v1500_v4 = vmul.f32 %v2276_v36, %v1157_v50 }
 0x138   : > { %1826 = vst [vmem:[%s2283_s22 + $0x7d0] sm:$0xff] %v1489_v17  ;;  %v828_v5 = vand.u32 255, %v492_v62  ;;  %v829_v6 = vand.u32 255, %v493_v63  ;;  %v494_v7 = vunpack.c.3.s8 %v206_v38  ;;  %v1501_v9 = vmul.f32 %v2276_v36, %v1158_v54  ;;  %v209_v17 = vld [vmem:[%s2265_s24 + $0x228] sm:$0xff] }
 0x139   : > { %1827 = vst.msk [vmem:[%s2283_s22 + $0x7d8] sm:$0xff] %vm1576_vm0, %v1490_v18  ;;  %v1161_v10 = vcvt.s32.f32 %v825_v1  ;;  %v1162_v11 = vcvt.s32.f32 %v826_v2  ;;  %v1163_v12 = vcvt.s32.f32 %v827_v3  ;;  %v1502_v13 = vmul.f32 %v2276_v36, %v1159_v61 }
 0x13a   : > { %1828 = vst [vmem:[%s2283_s22 + $0x7e0] sm:$0xff] %v1491_v25  ;;  %v1164_v14 = vcvt.s32.f32 %v828_v5  ;;  %v830_v15 = vand.u32 255, %v494_v7  ;;  %v495_v16 = vunpack.c.3.s8 %v207_v47  ;;  %v1503_v18 = vmul.f32 %v2276_v36, %v1160_v0 }
 0x13b   : > { %1829 = vst.msk [vmem:[%s2283_s22 + $0x7e8] sm:$0xff] %vm1576_vm0, %v1492_v33  ;;  %v1504_v19 = vmul.f32 %v2276_v36, %v1161_v10  ;;  %v1165_v20 = vcvt.s32.f32 %v829_v6  ;;  %v496_v21 = vunpack.c.0.s8 %v208_v8  ;;  %v1505_v22 = vmul.f32 %v2276_v36, %v1162_v11 }
 0x13c   : > { %1830 = vst [vmem:[%s2283_s22 + $0x7f0] sm:$0xff] %v1493_v39  ;;  %v1506_v23 = vmul.f32 %v2276_v36, %v1163_v12  ;;  %v1166_v24 = vcvt.s32.f32 %v830_v15  ;;  %v831_v25 = vand.u32 255, %v495_v16  ;;  %v497_v27 = vunpack.c.0.s8 %v209_v17 }
 0x13d   : > { %1831 = vst.msk [vmem:[%s2283_s22 + $0x7f8] sm:$0xff] %vm1576_vm0, %v1494_v43  ;;  %v832_v26 = vand.u32 255, %v496_v21  ;;  %v498_v28 = vunpack.c.1.s8 %v208_v8  ;;  %v499_v29 = vunpack.c.1.s8 %v209_v17  ;;  %v1507_v30 = vmul.f32 %v2276_v36, %v1164_v14  ;;  %v210_v43 = vld [vmem:[%s2265_s24 + $0x230] sm:$0xff] }
 0x13e   : > { %1832 = vst [vmem:[%s2283_s22 + $0x800] sm:$0xff] %v1495_v48  ;;  %v1167_v31 = vcvt.s32.f32 %v831_v25  ;;  %v500_v32 = vunpack.c.2.s8 %v208_v8  ;;  %v501_v33 = vunpack.c.2.s8 %v209_v17  ;;  %v833_v35 = vand.u32 255, %v497_v27 }
 0x13f   : > { %1833 = vst.msk [vmem:[%s2283_s22 + $0x808] sm:$0xff] %vm1576_vm0, %v1496_v49  ;;  %v1168_v34 = vcvt.s32.f32 %v832_v26  ;;  %v834_v37 = vand.u32 255, %v498_v28  ;;  %v835_v38 = vand.u32 255, %v499_v29  ;;  %v1508_v39 = vmul.f32 %v2276_v36, %v1165_v20 }
 0x140   : > { %1834 = vst [vmem:[%s2283_s22 + $0x810] sm:$0xff] %v1497_v52  ;;  %v836_v40 = vand.u32 255, %v500_v32  ;;  %v837_v41 = vand.u32 255, %v501_v33  ;;  %v502_v42 = vunpack.c.3.s8 %v208_v8  ;;  %v1509_v44 = vmul.f32 %v2276_v36, %v1166_v24  ;;  %v211_v52 = vld [vmem:[%s2265_s24 + $0x238] sm:$0xff] }
 0x141   : > { %1835 = vst.msk [vmem:[%s2283_s22 + $0x818] sm:$0xff] %vm1576_vm0, %v1498_v53  ;;  %v1169_v45 = vcvt.s32.f32 %v833_v35  ;;  %v1170_v46 = vcvt.s32.f32 %v834_v37  ;;  %v1171_v47 = vcvt.s32.f32 %v835_v38  ;;  %v1510_v48 = vmul.f32 %v2276_v36, %v1167_v31 }
 0x142   : > { %1836 = vst [vmem:[%s2283_s22 + $0x820] sm:$0xff] %v1499_v60  ;;  %v1172_v49 = vcvt.s32.f32 %v836_v40  ;;  %v838_v50 = vand.u32 255, %v502_v42  ;;  %v503_v51 = vunpack.c.3.s8 %v209_v17  ;;  %v1511_v53 = vmul.f32 %v2276_v36, %v1168_v34 }
 0x143   : > { %1837 = vst.msk [vmem:[%s2283_s22 + $0x828] sm:$0xff] %vm1576_vm0, %v1500_v4  ;;  %v1512_v54 = vmul.f32 %v2276_v36, %v1169_v45  ;;  %v1173_v55 = vcvt.s32.f32 %v837_v41  ;;  %v504_v56 = vunpack.c.0.s8 %v210_v43  ;;  %v1513_v57 = vmul.f32 %v2276_v36, %v1170_v46 }
 0x144   : > { %1838 = vst [vmem:[%s2283_s22 + $0x830] sm:$0xff] %v1501_v9  ;;  %v1514_v58 = vmul.f32 %v2276_v36, %v1171_v47  ;;  %v1174_v59 = vcvt.s32.f32 %v838_v50  ;;  %v839_v60 = vand.u32 255, %v503_v51  ;;  %v505_v62 = vunpack.c.0.s8 %v211_v52 }
 0x145   : > { %1839 = vst.msk [vmem:[%s2283_s22 + $0x838] sm:$0xff] %vm1576_vm0, %v1502_v13  ;;  %v840_v61 = vand.u32 255, %v504_v56  ;;  %v506_v63 = vunpack.c.1.s8 %v210_v43  ;;  %v507_v0 = vunpack.c.1.s8 %v211_v52  ;;  %v1515_v1 = vmul.f32 %v2276_v36, %v1172_v49  ;;  %v212_v13 = vld [vmem:[%s2265_s24 + $0x240] sm:$0xff] }
 0x146   : > { %1840 = vst [vmem:[%s2283_s22 + $0x840] sm:$0xff] %v1503_v18  ;;  %v1175_v2 = vcvt.s32.f32 %v839_v60  ;;  %v508_v3 = vunpack.c.2.s8 %v210_v43  ;;  %v509_v4 = vunpack.c.2.s8 %v211_v52  ;;  %v841_v6 = vand.u32 255, %v505_v62 }
 0x147   : > { %1841 = vst.msk [vmem:[%s2283_s22 + $0x848] sm:$0xff] %vm1576_vm0, %v1504_v19  ;;  %v1176_v5 = vcvt.s32.f32 %v840_v61  ;;  %v842_v7 = vand.u32 255, %v506_v63  ;;  %v843_v8 = vand.u32 255, %v507_v0  ;;  %v1516_v9 = vmul.f32 %v2276_v36, %v1173_v55 }
 0x148   : > { %1842 = vst [vmem:[%s2283_s22 + $0x850] sm:$0xff] %v1505_v22  ;;  %v844_v10 = vand.u32 255, %v508_v3  ;;  %v845_v11 = vand.u32 255, %v509_v4  ;;  %v510_v12 = vunpack.c.3.s8 %v210_v43  ;;  %v1517_v14 = vmul.f32 %v2276_v36, %v1174_v59  ;;  %v213_v22 = vld [vmem:[%s2265_s24 + $0x248] sm:$0xff] }
 0x149   : > { %1843 = vst.msk [vmem:[%s2283_s22 + $0x858] sm:$0xff] %vm1576_vm0, %v1506_v23  ;;  %v1177_v15 = vcvt.s32.f32 %v841_v6  ;;  %v1178_v16 = vcvt.s32.f32 %v842_v7  ;;  %v1179_v17 = vcvt.s32.f32 %v843_v8  ;;  %v1518_v18 = vmul.f32 %v2276_v36, %v1175_v2 }
 0x14a   : > { %1844 = vst [vmem:[%s2283_s22 + $0x860] sm:$0xff] %v1507_v30  ;;  %v1180_v19 = vcvt.s32.f32 %v844_v10  ;;  %v846_v20 = vand.u32 255, %v510_v12  ;;  %v511_v21 = vunpack.c.3.s8 %v211_v52  ;;  %v1519_v23 = vmul.f32 %v2276_v36, %v1176_v5 }
 0x14b   : > { %1845 = vst.msk [vmem:[%s2283_s22 + $0x868] sm:$0xff] %vm1576_vm0, %v1508_v39  ;;  %v1520_v24 = vmul.f32 %v2276_v36, %v1177_v15  ;;  %v1181_v25 = vcvt.s32.f32 %v845_v11  ;;  %v512_v26 = vunpack.c.0.s8 %v212_v13  ;;  %v1521_v27 = vmul.f32 %v2276_v36, %v1178_v16 }
 0x14c   : > { %1846 = vst [vmem:[%s2283_s22 + $0x870] sm:$0xff] %v1509_v44  ;;  %v1522_v28 = vmul.f32 %v2276_v36, %v1179_v17  ;;  %v1182_v29 = vcvt.s32.f32 %v846_v20  ;;  %v847_v30 = vand.u32 255, %v511_v21  ;;  %v513_v32 = vunpack.c.0.s8 %v213_v22 }
 0x14d   : > { %1847 = vst.msk [vmem:[%s2283_s22 + $0x878] sm:$0xff] %vm1576_vm0, %v1510_v48  ;;  %v848_v31 = vand.u32 255, %v512_v26  ;;  %v514_v33 = vunpack.c.1.s8 %v212_v13  ;;  %v515_v34 = vunpack.c.1.s8 %v213_v22  ;;  %v1523_v35 = vmul.f32 %v2276_v36, %v1180_v19  ;;  %v214_v48 = vld [vmem:[%s2265_s24 + $0x250] sm:$0xff] }
 0x14e   : > { %1848 = vst [vmem:[%s2283_s22 + $0x880] sm:$0xff] %v1511_v53  ;;  %v1183_v37 = vcvt.s32.f32 %v847_v30  ;;  %v516_v38 = vunpack.c.2.s8 %v212_v13  ;;  %v517_v39 = vunpack.c.2.s8 %v213_v22  ;;  %v849_v41 = vand.u32 255, %v513_v32 }
 0x14f   : > { %1849 = vst.msk [vmem:[%s2283_s22 + $0x888] sm:$0xff] %vm1576_vm0, %v1512_v54  ;;  %v1184_v40 = vcvt.s32.f32 %v848_v31  ;;  %v850_v42 = vand.u32 255, %v514_v33  ;;  %v851_v43 = vand.u32 255, %v515_v34  ;;  %v1524_v44 = vmul.f32 %v2276_v36, %v1181_v25 }
 0x150   : > { %1850 = vst [vmem:[%s2283_s22 + $0x890] sm:$0xff] %v1513_v57  ;;  %v852_v45 = vand.u32 255, %v516_v38  ;;  %v853_v46 = vand.u32 255, %v517_v39  ;;  %v518_v47 = vunpack.c.3.s8 %v212_v13  ;;  %v1525_v49 = vmul.f32 %v2276_v36, %v1182_v29  ;;  %v215_v57 = vld [vmem:[%s2265_s24 + $0x258] sm:$0xff] }
 0x151   : > { %1851 = vst.msk [vmem:[%s2283_s22 + $0x898] sm:$0xff] %vm1576_vm0, %v1514_v58  ;;  %v1185_v50 = vcvt.s32.f32 %v849_v41  ;;  %v1186_v51 = vcvt.s32.f32 %v850_v42  ;;  %v1187_v52 = vcvt.s32.f32 %v851_v43  ;;  %v1526_v53 = vmul.f32 %v2276_v36, %v1183_v37 }
 0x152   : > { %1852 = vst [vmem:[%s2283_s22 + $0x8a0] sm:$0xff] %v1515_v1  ;;  %v1188_v54 = vcvt.s32.f32 %v852_v45  ;;  %v854_v55 = vand.u32 255, %v518_v47  ;;  %v519_v56 = vunpack.c.3.s8 %v213_v22  ;;  %v1527_v58 = vmul.f32 %v2276_v36, %v1184_v40 }
 0x153   : > { %1853 = vst.msk [vmem:[%s2283_s22 + $0x8a8] sm:$0xff] %vm1576_vm0, %v1516_v9  ;;  %v1528_v59 = vmul.f32 %v2276_v36, %v1185_v50  ;;  %v1189_v60 = vcvt.s32.f32 %v853_v46  ;;  %v520_v61 = vunpack.c.0.s8 %v214_v48  ;;  %v1529_v62 = vmul.f32 %v2276_v36, %v1186_v51 }
 0x154   : > { %1854 = vst [vmem:[%s2283_s22 + $0x8b0] sm:$0xff] %v1517_v14  ;;  %v1530_v63 = vmul.f32 %v2276_v36, %v1187_v52  ;;  %v1190_v0 = vcvt.s32.f32 %v854_v55  ;;  %v855_v1 = vand.u32 255, %v519_v56  ;;  %v521_v3 = vunpack.c.0.s8 %v215_v57 }
 0x155   : > { %1855 = vst.msk [vmem:[%s2283_s22 + $0x8b8] sm:$0xff] %vm1576_vm0, %v1518_v18  ;;  %v856_v2 = vand.u32 255, %v520_v61  ;;  %v522_v4 = vunpack.c.1.s8 %v214_v48  ;;  %v523_v5 = vunpack.c.1.s8 %v215_v57  ;;  %v1531_v6 = vmul.f32 %v2276_v36, %v1188_v54  ;;  %v216_v18 = vld [vmem:[%s2265_s24 + $0x260] sm:$0xff] }
 0x156   : > { %1856 = vst [vmem:[%s2283_s22 + $0x8c0] sm:$0xff] %v1519_v23  ;;  %v1191_v7 = vcvt.s32.f32 %v855_v1  ;;  %v524_v8 = vunpack.c.2.s8 %v214_v48  ;;  %v525_v9 = vunpack.c.2.s8 %v215_v57  ;;  %v857_v11 = vand.u32 255, %v521_v3 }
 0x157   : > { %1857 = vst.msk [vmem:[%s2283_s22 + $0x8c8] sm:$0xff] %vm1576_vm0, %v1520_v24  ;;  %v1192_v10 = vcvt.s32.f32 %v856_v2  ;;  %v858_v12 = vand.u32 255, %v522_v4  ;;  %v859_v13 = vand.u32 255, %v523_v5  ;;  %v1532_v14 = vmul.f32 %v2276_v36, %v1189_v60 }
 0x158   : > { %1858 = vst [vmem:[%s2283_s22 + $0x8d0] sm:$0xff] %v1521_v27  ;;  %v860_v15 = vand.u32 255, %v524_v8  ;;  %v861_v16 = vand.u32 255, %v525_v9  ;;  %v526_v17 = vunpack.c.3.s8 %v214_v48  ;;  %v1533_v19 = vmul.f32 %v2276_v36, %v1190_v0  ;;  %v217_v27 = vld [vmem:[%s2265_s24 + $0x268] sm:$0xff] }
 0x159   : > { %1859 = vst.msk [vmem:[%s2283_s22 + $0x8d8] sm:$0xff] %vm1576_vm0, %v1522_v28  ;;  %v1193_v20 = vcvt.s32.f32 %v857_v11  ;;  %v1194_v21 = vcvt.s32.f32 %v858_v12  ;;  %v1195_v22 = vcvt.s32.f32 %v859_v13  ;;  %v1534_v23 = vmul.f32 %v2276_v36, %v1191_v7 }
 0x15a   : > { %1860 = vst [vmem:[%s2283_s22 + $0x8e0] sm:$0xff] %v1523_v35  ;;  %v1196_v24 = vcvt.s32.f32 %v860_v15  ;;  %v862_v25 = vand.u32 255, %v526_v17  ;;  %v527_v26 = vunpack.c.3.s8 %v215_v57  ;;  %v1535_v28 = vmul.f32 %v2276_v36, %v1192_v10 }
 0x15b   : > { %1861 = vst.msk [vmem:[%s2283_s22 + $0x8e8] sm:$0xff] %vm1576_vm0, %v1524_v44  ;;  %v1536_v29 = vmul.f32 %v2276_v36, %v1193_v20  ;;  %v1197_v30 = vcvt.s32.f32 %v861_v16  ;;  %v528_v31 = vunpack.c.0.s8 %v216_v18  ;;  %v1537_v32 = vmul.f32 %v2276_v36, %v1194_v21 }
 0x15c   : > { %1862 = vst [vmem:[%s2283_s22 + $0x8f0] sm:$0xff] %v1525_v49  ;;  %v1538_v33 = vmul.f32 %v2276_v36, %v1195_v22  ;;  %v1198_v34 = vcvt.s32.f32 %v862_v25  ;;  %v863_v35 = vand.u32 255, %v527_v26  ;;  %v529_v38 = vunpack.c.0.s8 %v217_v27 }
 0x15d   : > { %1863 = vst.msk [vmem:[%s2283_s22 + $0x8f8] sm:$0xff] %vm1576_vm0, %v1526_v53  ;;  %v864_v37 = vand.u32 255, %v528_v31  ;;  %v530_v39 = vunpack.c.1.s8 %v216_v18  ;;  %v531_v40 = vunpack.c.1.s8 %v217_v27  ;;  %v1539_v41 = vmul.f32 %v2276_v36, %v1196_v24  ;;  %v218_v53 = vld [vmem:[%s2265_s24 + $0x270] sm:$0xff] }
 0x15e   : > { %1864 = vst [vmem:[%s2283_s22 + $0x900] sm:$0xff] %v1527_v58  ;;  %v1199_v42 = vcvt.s32.f32 %v863_v35  ;;  %v532_v43 = vunpack.c.2.s8 %v216_v18  ;;  %v533_v44 = vunpack.c.2.s8 %v217_v27  ;;  %v865_v46 = vand.u32 255, %v529_v38 }
 0x15f   : > { %1865 = vst.msk [vmem:[%s2283_s22 + $0x908] sm:$0xff] %vm1576_vm0, %v1528_v59  ;;  %v1200_v45 = vcvt.s32.f32 %v864_v37  ;;  %v866_v47 = vand.u32 255, %v530_v39  ;;  %v867_v48 = vand.u32 255, %v531_v40  ;;  %v1540_v49 = vmul.f32 %v2276_v36, %v1197_v30 }
 0x160   : > { %1866 = vst [vmem:[%s2283_s22 + $0x910] sm:$0xff] %v1529_v62  ;;  %v868_v50 = vand.u32 255, %v532_v43  ;;  %v869_v51 = vand.u32 255, %v533_v44  ;;  %v534_v52 = vunpack.c.3.s8 %v216_v18  ;;  %v1541_v54 = vmul.f32 %v2276_v36, %v1198_v34  ;;  %v219_v62 = vld [vmem:[%s2265_s24 + $0x278] sm:$0xff] }
 0x161   : > { %1867 = vst.msk [vmem:[%s2283_s22 + $0x918] sm:$0xff] %vm1576_vm0, %v1530_v63  ;;  %v1201_v55 = vcvt.s32.f32 %v865_v46  ;;  %v1202_v56 = vcvt.s32.f32 %v866_v47  ;;  %v1203_v57 = vcvt.s32.f32 %v867_v48  ;;  %v1542_v58 = vmul.f32 %v2276_v36, %v1199_v42 }
 0x162   : > { %1868 = vst [vmem:[%s2283_s22 + $0x920] sm:$0xff] %v1531_v6  ;;  %v1204_v59 = vcvt.s32.f32 %v868_v50  ;;  %v870_v60 = vand.u32 255, %v534_v52  ;;  %v535_v61 = vunpack.c.3.s8 %v217_v27  ;;  %v1543_v63 = vmul.f32 %v2276_v36, %v1200_v45 }
 0x163   : > { %1869 = vst.msk [vmem:[%s2283_s22 + $0x928] sm:$0xff] %vm1576_vm0, %v1532_v14  ;;  %v1544_v0 = vmul.f32 %v2276_v36, %v1201_v55  ;;  %v1205_v1 = vcvt.s32.f32 %v869_v51  ;;  %v536_v2 = vunpack.c.0.s8 %v218_v53  ;;  %v1545_v3 = vmul.f32 %v2276_v36, %v1202_v56 }
 0x164   : > { %1870 = vst [vmem:[%s2283_s22 + $0x930] sm:$0xff] %v1533_v19  ;;  %v1546_v4 = vmul.f32 %v2276_v36, %v1203_v57  ;;  %v1206_v5 = vcvt.s32.f32 %v870_v60  ;;  %v871_v6 = vand.u32 255, %v535_v61  ;;  %v537_v8 = vunpack.c.0.s8 %v219_v62 }
 0x165   : > { %1871 = vst.msk [vmem:[%s2283_s22 + $0x938] sm:$0xff] %vm1576_vm0, %v1534_v23  ;;  %v872_v7 = vand.u32 255, %v536_v2  ;;  %v538_v9 = vunpack.c.1.s8 %v218_v53  ;;  %v539_v10 = vunpack.c.1.s8 %v219_v62  ;;  %v1547_v11 = vmul.f32 %v2276_v36, %v1204_v59  ;;  %v220_v23 = vld [vmem:[%s2265_s24 + $0x280] sm:$0xff] }
 0x166   : > { %1872 = vst [vmem:[%s2283_s22 + $0x940] sm:$0xff] %v1535_v28  ;;  %v1207_v12 = vcvt.s32.f32 %v871_v6  ;;  %v540_v13 = vunpack.c.2.s8 %v218_v53  ;;  %v541_v14 = vunpack.c.2.s8 %v219_v62  ;;  %v873_v16 = vand.u32 255, %v537_v8 }
 0x167   : > { %1873 = vst.msk [vmem:[%s2283_s22 + $0x948] sm:$0xff] %vm1576_vm0, %v1536_v29  ;;  %v1208_v15 = vcvt.s32.f32 %v872_v7  ;;  %v874_v17 = vand.u32 255, %v538_v9  ;;  %v875_v18 = vand.u32 255, %v539_v10  ;;  %v1548_v19 = vmul.f32 %v2276_v36, %v1205_v1 }
 0x168   : > { %1874 = vst [vmem:[%s2283_s22 + $0x950] sm:$0xff] %v1537_v32  ;;  %v876_v20 = vand.u32 255, %v540_v13  ;;  %v877_v21 = vand.u32 255, %v541_v14  ;;  %v542_v22 = vunpack.c.3.s8 %v218_v53  ;;  %v1549_v24 = vmul.f32 %v2276_v36, %v1206_v5  ;;  %v221_v32 = vld [vmem:[%s2265_s24 + $0x288] sm:$0xff] }
 0x169   : > { %1875 = vst.msk [vmem:[%s2283_s22 + $0x958] sm:$0xff] %vm1576_vm0, %v1538_v33  ;;  %v1209_v25 = vcvt.s32.f32 %v873_v16  ;;  %v1210_v26 = vcvt.s32.f32 %v874_v17  ;;  %v1211_v27 = vcvt.s32.f32 %v875_v18  ;;  %v1550_v28 = vmul.f32 %v2276_v36, %v1207_v12 }
 0x16a   : > { %1876 = vst [vmem:[%s2283_s22 + $0x960] sm:$0xff] %v1539_v41  ;;  %v1212_v29 = vcvt.s32.f32 %v876_v20  ;;  %v878_v30 = vand.u32 255, %v542_v22  ;;  %v543_v31 = vunpack.c.3.s8 %v219_v62  ;;  %v1551_v33 = vmul.f32 %v2276_v36, %v1208_v15 }
 0x16b   : > { %1877 = vst.msk [vmem:[%s2283_s22 + $0x968] sm:$0xff] %vm1576_vm0, %v1540_v49  ;;  %v1552_v34 = vmul.f32 %v2276_v36, %v1209_v25  ;;  %v1213_v35 = vcvt.s32.f32 %v877_v21  ;;  %v544_v37 = vunpack.c.0.s8 %v220_v23  ;;  %v1553_v38 = vmul.f32 %v2276_v36, %v1210_v26 }
 0x16c   : > { %1878 = vst [vmem:[%s2283_s22 + $0x970] sm:$0xff] %v1541_v54  ;;  %v1554_v39 = vmul.f32 %v2276_v36, %v1211_v27  ;;  %v1214_v40 = vcvt.s32.f32 %v878_v30  ;;  %v879_v41 = vand.u32 255, %v543_v31  ;;  %v545_v43 = vunpack.c.0.s8 %v221_v32 }
 0x16d   : > { %1879 = vst.msk [vmem:[%s2283_s22 + $0x978] sm:$0xff] %vm1576_vm0, %v1542_v58  ;;  %v880_v42 = vand.u32 255, %v544_v37  ;;  %v546_v44 = vunpack.c.1.s8 %v220_v23  ;;  %v547_v45 = vunpack.c.1.s8 %v221_v32  ;;  %v1555_v46 = vmul.f32 %v2276_v36, %v1212_v29  ;;  %v222_v58 = vld [vmem:[%s2265_s24 + $0x290] sm:$0xff] }
 0x16e   : > { %1880 = vst [vmem:[%s2283_s22 + $0x980] sm:$0xff] %v1543_v63  ;;  %v1215_v47 = vcvt.s32.f32 %v879_v41  ;;  %v548_v48 = vunpack.c.2.s8 %v220_v23  ;;  %v549_v49 = vunpack.c.2.s8 %v221_v32  ;;  %v881_v51 = vand.u32 255, %v545_v43 }
 0x16f   : > { %1881 = vst.msk [vmem:[%s2283_s22 + $0x988] sm:$0xff] %vm1576_vm0, %v1544_v0  ;;  %v1216_v50 = vcvt.s32.f32 %v880_v42  ;;  %v882_v52 = vand.u32 255, %v546_v44  ;;  %v883_v53 = vand.u32 255, %v547_v45  ;;  %v1556_v54 = vmul.f32 %v2276_v36, %v1213_v35 }
 0x170   : > { %1882 = vst [vmem:[%s2283_s22 + $0x990] sm:$0xff] %v1545_v3  ;;  %v884_v55 = vand.u32 255, %v548_v48  ;;  %v885_v56 = vand.u32 255, %v549_v49  ;;  %v550_v57 = vunpack.c.3.s8 %v220_v23  ;;  %v1557_v59 = vmul.f32 %v2276_v36, %v1214_v40  ;;  %v223_v3 = vld [vmem:[%s2265_s24 + $0x298] sm:$0xff] }
 0x171   : > { %1883 = vst.msk [vmem:[%s2283_s22 + $0x998] sm:$0xff] %vm1576_vm0, %v1546_v4  ;;  %v1217_v60 = vcvt.s32.f32 %v881_v51  ;;  %v1218_v61 = vcvt.s32.f32 %v882_v52  ;;  %v1219_v62 = vcvt.s32.f32 %v883_v53  ;;  %v1558_v63 = vmul.f32 %v2276_v36, %v1215_v47 }
 0x172   : > { %1884 = vst [vmem:[%s2283_s22 + $0x9a0] sm:$0xff] %v1547_v11  ;;  %v1220_v0 = vcvt.s32.f32 %v884_v55  ;;  %v886_v1 = vand.u32 255, %v550_v57  ;;  %v551_v2 = vunpack.c.3.s8 %v221_v32  ;;  %v1559_v4 = vmul.f32 %v2276_v36, %v1216_v50 }
 0x173   : > { %1885 = vst.msk [vmem:[%s2283_s22 + $0x9a8] sm:$0xff] %vm1576_vm0, %v1548_v19  ;;  %v1560_v5 = vmul.f32 %v2276_v36, %v1217_v60  ;;  %v1221_v6 = vcvt.s32.f32 %v885_v56  ;;  %v552_v7 = vunpack.c.0.s8 %v222_v58  ;;  %v1561_v8 = vmul.f32 %v2276_v36, %v1218_v61 }
 0x174   : > { %1886 = vst [vmem:[%s2283_s22 + $0x9b0] sm:$0xff] %v1549_v24  ;;  %v1562_v9 = vmul.f32 %v2276_v36, %v1219_v62  ;;  %v1222_v10 = vcvt.s32.f32 %v886_v1  ;;  %v887_v11 = vand.u32 255, %v551_v2  ;;  %v553_v13 = vunpack.c.0.s8 %v223_v3 }
 0x175   : > { %1887 = vst.msk [vmem:[%s2283_s22 + $0x9b8] sm:$0xff] %vm1576_vm0, %v1550_v28  ;;  %v888_v12 = vand.u32 255, %v552_v7  ;;  %v554_v14 = vunpack.c.1.s8 %v222_v58  ;;  %v555_v15 = vunpack.c.1.s8 %v223_v3  ;;  %v1563_v16 = vmul.f32 %v2276_v36, %v1220_v0 }
 0x176   : > { %1888 = vst [vmem:[%s2283_s22 + $0x9c0] sm:$0xff] %v1551_v33  ;;  %v1223_v17 = vcvt.s32.f32 %v887_v11  ;;  %v556_v18 = vunpack.c.2.s8 %v222_v58  ;;  %v557_v19 = vunpack.c.2.s8 %v223_v3  ;;  %v889_v21 = vand.u32 255, %v553_v13 }
 0x177   : > { %1889 = vst.msk [vmem:[%s2283_s22 + $0x9c8] sm:$0xff] %vm1576_vm0, %v1552_v34  ;;  %v1224_v20 = vcvt.s32.f32 %v888_v12  ;;  %v890_v22 = vand.u32 255, %v554_v14  ;;  %v891_v23 = vand.u32 255, %v555_v15  ;;  %v1564_v24 = vmul.f32 %v2276_v36, %v1221_v6 }
 0x178   : > { %1890 = vst [vmem:[%s2283_s22 + $0x9d0] sm:$0xff] %v1553_v38  ;;  %v892_v25 = vand.u32 255, %v556_v18  ;;  %v893_v26 = vand.u32 255, %v557_v19  ;;  %v558_v27 = vunpack.c.3.s8 %v222_v58  ;;  %v1565_v28 = vmul.f32 %v2276_v36, %v1222_v10 }
 0x179   : > { %1891 = vst.msk [vmem:[%s2283_s22 + $0x9d8] sm:$0xff] %vm1576_vm0, %v1554_v39  ;;  %v1225_v29 = vcvt.s32.f32 %v889_v21  ;;  %v1226_v30 = vcvt.s32.f32 %v890_v22  ;;  %v1566_v31 = vmul.f32 %v2276_v36, %v1223_v17  ;;  %v1227_v32 = vcvt.s32.f32 %v891_v23 }
 0x17a   : > { %1892 = vst [vmem:[%s2283_s22 + $0x9e0] sm:$0xff] %v1555_v46  ;;  %v894_v33 = vand.u32 255, %v558_v27  ;;  %v559_v34 = vunpack.c.3.s8 %v223_v3  ;;  %v1567_v35 = vmul.f32 %v2276_v36, %v1224_v20  ;;  %v1228_v37 = vcvt.s32.f32 %v892_v25 }
 0x17b   : > { %1893 = vst.msk [vmem:[%s2283_s22 + $0x9e8] sm:$0xff] %vm1576_vm0, %v1556_v54  ;;  %v1568_v38 = vmul.f32 %v2276_v36, %v1225_v29  ;;  %v1229_v39 = vcvt.s32.f32 %v893_v26  ;;  %v1569_v41 = vmul.f32 %v2276_v36, %v1226_v30  ;;  %v1570_v43 = vmul.f32 %v2276_v36, %v1227_v32 }
 0x17c   : > { %1894 = vst [vmem:[%s2283_s22 + $0x9f0] sm:$0xff] %v1557_v59  ;;  %v895_v40 = vand.u32 255, %v559_v34  ;;  %v1230_v42 = vcvt.s32.f32 %v894_v33  ;;  %v1571_v45 = vmul.f32 %v2276_v36, %v1228_v37 }
 0x17d   : > { %1895 = vst.msk [vmem:[%s2283_s22 + $0x9f8] sm:$0xff] %vm1576_vm0, %v1558_v63  ;;  %v1572_v46 = vmul.f32 %v2276_v36, %v1229_v39 }
 0x17e   : > { %1896 = vst [vmem:[%s2283_s22 + $0xa00] sm:$0xff] %v1559_v4  ;;  %v1231_v44 = vcvt.s32.f32 %v895_v40  ;;  %v1573_v47 = vmul.f32 %v2276_v36, %v1230_v42 }
 0x17f   : > { %1897 = vst.msk [vmem:[%s2283_s22 + $0xa08] sm:$0xff] %vm1576_vm0, %v1560_v5 }
 0x180   : > { %1898 = vst [vmem:[%s2283_s22 + $0xa10] sm:$0xff] %v1561_v8  ;;  %v1574_v48 = vmul.f32 %v2276_v36, %v1231_v44 }
 0x181   : > { %1899 = vst.msk [vmem:[%s2283_s22 + $0xa18] sm:$0xff] %vm1576_vm0, %v1562_v9 }
 0x182   : > { %1900 = vst [vmem:[%s2283_s22 + $0xa20] sm:$0xff] %v1563_v16 }
 0x183   : > { %1901 = vst.msk [vmem:[%s2283_s22 + $0xa28] sm:$0xff] %vm1576_vm0, %v1564_v24 }
 0x184   : > { %1902 = vst [vmem:[%s2283_s22 + $0xa30] sm:$0xff] %v1565_v28 }
 0x185   : > { %1903 = vst.msk [vmem:[%s2283_s22 + $0xa38] sm:$0xff] %vm1576_vm0, %v1566_v31 }
 0x186   : > { %1904 = vst [vmem:[%s2283_s22 + $0xa40] sm:$0xff] %v1567_v35 }
 0x187   : > { %1905 = vst.msk [vmem:[%s2283_s22 + $0xa48] sm:$0xff] %vm1576_vm0, %v1568_v38 }
 0x188   : > { %1906 = vst [vmem:[%s2283_s22 + $0xa50] sm:$0xff] %v1569_v41 }
 0x189   : > { %1907 = vst.msk [vmem:[%s2283_s22 + $0xa58] sm:$0xff] %vm1576_vm0, %v1570_v43 }
 0x18a   : > { %1908 = vst [vmem:[%s2283_s22 + $0xa60] sm:$0xff] %v1571_v45 }
 0x18b   : > { %1909 = vst.msk [vmem:[%s2283_s22 + $0xa68] sm:$0xff] %vm1576_vm0, %v1572_v46 }
 0x18c   : > { %1910 = vst [vmem:[%s2283_s22 + $0xa70] sm:$0xff] %v1573_v47 }
 0x18d   : > { %1911 = vst.msk [vmem:[%s2283_s22 + $0xa78] sm:$0xff] %vm1576_vm0, %v1574_v48 }
 0x18e   : > { %2127 = shalt.err (!%p2124_p7)
}
 0x18f   : > { %s2171_s19 = smov 256   ;;  %s2172_s20 = smov 16  }
 0x190   : > { %2017 = dma.vmem_to_hbm [thread:$0]  (%p2229_p11), %s1927_s28, 43008, %s1929_s29, %s1913_s30, %s2171_s19, %s2171_s19, %s2172_s20  }
 0x191 PF: > { %s1943_s21 = sand.u32 1, %s2154_s6   ;;  %p2024_p8 = pnand %p2004_p9, %p2233_p12 }
 0x192   : > { %s1944_s23 = scalar_lea.sflag [#allocation4], %s1943_s21 }
 0x193   : > { %p2025_p10 = pneg %p2024_p8 }
 0x195   : > { %2149 = dma.done.wait (%p2025_p10), %s1944_s23, 43008  }
 0x196   : > { %2151 = vsyncadd (%p2025_p10), %s1944_s23, 4294924288  ;;  %p14_p1 = scmp.ge.s32.totalorder %s2208_s12, 4   ;;  %s3240_s6 = smov %s2158_s7 }
 0x197   : > { %s3241_s7 = smov %s2162_s8  ;;  %s3242_s8 = smov %s2220_s15 }
 0x198   : > { %s3243_s9 = smov %s2208_s12  ;;  %16 = sbr.rel (!%p14_p1) target bundleno = 5 (0x5), region = 69 }
 0x19d   :  { %1950 = vsyncpa [#allocation3], 1 }
 0x19e   :  { %1952 = vsyncpa [#allocation3 + $0x1], 1 }
 0x19f   :  { %1953 = vsyncpa [#allocation4], 1 }
 0x1a0   :  { %1955 = vsyncpa [#allocation4 + $0x1], 1 }

</bundles_post_ra>
